<compile_context>
chip_gen: v6e
topology: v6e:2x2x1
jax: 0.10.0
libtpu: 0.0.40
codegen_flags: <defaults>
</compile_context>

<pallas_src>
import jax
import jax.numpy as jnp
from jax.experimental import pallas as pl
from jax.experimental.pallas import tpu as pltpu

LANES = 128  # vreg lane width


def conv2d_3x3_kernel(x_ref, w_ref, b_ref, o_ref):
    """Direct 3x3 valid convolution over the whole batch, lane-dense layout.

    x_ref: (N, Cin, Hp, 128)   VMEM  (W zero-padded to 128 lanes, H padded by K-1)
    w_ref: (Cout*Cin*K*K,)     SMEM  (flat, row-major [co, ci, kh, kw])
    b_ref: (Cout,)             SMEM
    o_ref: (N, Cout, Hb, 128)  VMEM  (rows >= Ho / lanes >= Wo are junk, sliced
                                      off in the wrapper; Hb = Hp - K + 1)
    """
    N, Cin, Hp, L = x_ref.shape
    _, Cout, Hb, _ = o_ref.shape
    K = Hp - Hb + 1

    for n in range(N):
        # One f32 accumulator slab per output channel, initialized with the bias.
        accs = [jnp.full((Hb, L), b_ref[co], dtype=jnp.float32)
                for co in range(Cout)]
        for ci in range(Cin):
            for kh in range(K):
                # kh tap: static sublane-offset read, full 128-lane width.
                rows = x_ref[n, ci, kh:kh + Hb, :].astype(jnp.float32)
                for kw in range(K):
                    # kw tap: explicit lane rotate on the XLU (frees VPU/load
                    # slots); wrapped lanes land beyond column Wo and are
                    # discarded by the wrapper slice.
                    patch = rows if kw == 0 else pltpu.roll(rows, shift=L - kw, axis=1)
                    base = (ci * K + kh) * K + kw
                    # Patch is computed once and reused across all Cout; the
                    # weight is a scalar SMEM read feeding the VPU multiply.
                    for co in range(Cout):
                        accs[co] = accs[co] + patch * w_ref[co * Cin * K * K + base]
        for co in range(Cout):
            # Full (Hb, 128) store: unmasked, lane- and sublane-dense.
            o_ref[n, co, :, :] = accs[co].astype(o_ref.dtype)


def conv2d_3x3(x, w, b):
    """x: (N, Cin, H, W) f32; w: (Cout, Cin, 3, 3); b: (Cout,) -> (N, Cout, H-2, W-2)."""
    N, Cin, H, W = x.shape
    Cout, _, K, _ = w.shape
    Ho, Wo = H - K + 1, W - K + 1
    assert W <= LANES, "this small-conv kernel keeps the whole W axis in the lane dim"

    # Layout plumbing only (no compute hoisted out of the kernel): pad W up to
    # the 128-lane vreg width and H by K-1 zero rows so every kernel access is
    # a full-width, unmasked tile.
    x_p = jnp.pad(x, ((0, 0), (0, 0), (0, K - 1), (0, LANES - W)))
    w_flat = w.reshape(-1)  # 1-D SMEM buffer (a 4-D SMEM ref would pad to (8,128))

    out_p = pl.pallas_call(
        conv2d_3x3_kernel,
        out_shape=jax.ShapeDtypeStruct((N, Cout, H, LANES), x.dtype),
        grid_spec=pltpu.PrefetchScalarGridSpec(
            num_scalar_prefetch=0,
            grid=(1,),  # whole problem in one invocation: ~20 KiB working set
            in_specs=[
                pl.BlockSpec((N, Cin, H + K - 1, LANES), lambda i: (0, 0, 0, 0)),
                pl.BlockSpec(memory_space=pltpu.MemorySpace.SMEM),
                pl.BlockSpec(memory_space=pltpu.MemorySpace.SMEM),
            ],
            out_specs=pl.BlockSpec((N, Cout, H, LANES), lambda i: (0, 0, 0, 0)),
        ),
        compiler_params=pltpu.CompilerParams(
            dimension_semantics=("arbitrary",),
        ),
    )(x_p, w_flat, b)

    # Strip the lane/row padding back off.
    return out_p[:, :, :Ho, :Wo]


if __name__ == "__main__":
    key = jax.random.PRNGKey(0)
    kx, kw_, kb = jax.random.split(key, 3)

    # Small shapes consistent with the module: Conv2d(3, 3, kernel_size=3).
    N, Cin, H, W = 2, 3, 16, 16
    Cout, K = 3, 3

    x = jax.random.normal(kx, (N, Cin, H, W), dtype=jnp.float32)
    # Deterministic, PyTorch-like uniform(-bound, bound) init, bound = 1/sqrt(Cin*K*K).
    bound = 1.0 / (Cin * K * K) ** 0.5
    w = jax.random.uniform(kw_, (Cout, Cin, K, K), minval=-bound, maxval=bound,
                           dtype=jnp.float32)
    b = jax.random.uniform(kb, (Cout,), minval=-bound, maxval=bound,
                           dtype=jnp.float32)

    y = conv2d_3x3(x, w, b)
    y = jax.block_until_ready(y)

    # Cross-check against XLA's conv for correctness.
    y_ref = jax.lax.conv_general_dilated(
        x, w, window_strides=(1, 1), padding="VALID",
        dimension_numbers=("NCHW", "OIHW", "NCHW"),
    ) + b[None, :, None, None]
    assert y.shape == (N, Cout, H - 2, W - 2)
    assert jnp.max(jnp.abs(y - y_ref)) < 1e-4

    print("KERNEL_OK")
</pallas_src>

<mosaic_0001>
module attributes {stable_mosaic.version = 11 : i64} {
  func.func @conv2d_3x3_kernel(%arg0: i32, %arg1: memref<2x3x18x128xf32, #tpu.memory_space<vmem>>, %arg2: memref<81xf32, #tpu.memory_space<smem>>, %arg3: memref<3xf32, #tpu.memory_space<smem>>, %arg4: memref<2x3x16x128xf32, #tpu.memory_space<vmem>>) attributes {dimension_semantics = [#tpu.dimension_semantics<arbitrary>], iteration_bounds = array<i64: 1>, scalar_prefetch = 0 : i64, scratch_operands = 0 : i64, tpu.core_type = #tpu.core_type<tc>, window_params = [{pipeline_mode = #tpu.pipeline_mode<synchronous>, transform_indices = @transform_0, window_bounds = array<i64: 2, 3, 18, 128>}, {transform_indices = @transform_1, window_bounds = array<i64: 81>}, {transform_indices = @transform_2, window_bounds = array<i64: 3>}, {pipeline_mode = #tpu.pipeline_mode<synchronous>, transform_indices = @transform_3, window_bounds = array<i64: 2, 3, 16, 128>}]} {
    %c0 = arith.constant 0 : index
    %0 = memref.load %arg3[%c0] : memref<3xf32, #tpu.memory_space<smem>>
    %1 = vector.broadcast %0 : f32 to vector<16x128xf32>
    %c1 = arith.constant 1 : index
    %2 = memref.load %arg3[%c1] : memref<3xf32, #tpu.memory_space<smem>>
    %3 = vector.broadcast %2 : f32 to vector<16x128xf32>
    %c2 = arith.constant 2 : index
    %4 = memref.load %arg3[%c2] : memref<3xf32, #tpu.memory_space<smem>>
    %5 = vector.broadcast %4 : f32 to vector<16x128xf32>
    %c0_0 = arith.constant 0 : index
    %c0_1 = arith.constant 0 : index
    %c0_2 = arith.constant 0 : index
    %c0_3 = arith.constant 0 : index
    %6 = vector.load %arg1[%c0_0, %c0_1, %c0_2, %c0_3] : memref<2x3x18x128xf32, #tpu.memory_space<vmem>>, vector<1x1x16x128xf32>
    %7 = vector.shape_cast %6 : vector<1x1x16x128xf32> to vector<16x128xf32>
    %c0_4 = arith.constant 0 : index
    %8 = memref.load %arg2[%c0_4] : memref<81xf32, #tpu.memory_space<smem>>
    %9 = vector.broadcast %8 : f32 to vector<16x128xf32>
    %10 = arith.mulf %7, %9 : vector<16x128xf32>
    %11 = arith.addf %1, %10 : vector<16x128xf32>
    %c27 = arith.constant 27 : index
    %12 = memref.load %arg2[%c27] : memref<81xf32, #tpu.memory_space<smem>>
    %13 = vector.broadcast %12 : f32 to vector<16x128xf32>
    %14 = arith.mulf %7, %13 : vector<16x128xf32>
    %15 = arith.addf %3, %14 : vector<16x128xf32>
    %c54 = arith.constant 54 : index
    %16 = memref.load %arg2[%c54] : memref<81xf32, #tpu.memory_space<smem>>
    %17 = vector.broadcast %16 : f32 to vector<16x128xf32>
    %18 = arith.mulf %7, %17 : vector<16x128xf32>
    %19 = arith.addf %5, %18 : vector<16x128xf32>
    %c127_i32 = arith.constant 127 : i32
    %20 = tpu.dynamic_rotate %7 by %c127_i32 dim 1 : vector<16x128xf32>, i32 -> vector<16x128xf32>
    %c1_5 = arith.constant 1 : index
    %21 = memref.load %arg2[%c1_5] : memref<81xf32, #tpu.memory_space<smem>>
    %22 = vector.broadcast %21 : f32 to vector<16x128xf32>
    %23 = arith.mulf %20, %22 : vector<16x128xf32>
    %24 = arith.addf %11, %23 : vector<16x128xf32>
    %c28 = arith.constant 28 : index
    %25 = memref.load %arg2[%c28] : memref<81xf32, #tpu.memory_space<smem>>
    %26 = vector.broadcast %25 : f32 to vector<16x128xf32>
    %27 = arith.mulf %20, %26 : vector<16x128xf32>
    %28 = arith.addf %15, %27 : vector<16x128xf32>
    %c55 = arith.constant 55 : index
    %29 = memref.load %arg2[%c55] : memref<81xf32, #tpu.memory_space<smem>>
    %30 = vector.broadcast %29 : f32 to vector<16x128xf32>
    %31 = arith.mulf %20, %30 : vector<16x128xf32>
    %32 = arith.addf %19, %31 : vector<16x128xf32>
    %c126_i32 = arith.constant 126 : i32
    %33 = tpu.dynamic_rotate %7 by %c126_i32 dim 1 : vector<16x128xf32>, i32 -> vector<16x128xf32>
    %c2_6 = arith.constant 2 : index
    %34 = memref.load %arg2[%c2_6] : memref<81xf32, #tpu.memory_space<smem>>
    %35 = vector.broadcast %34 : f32 to vector<16x128xf32>
    %36 = arith.mulf %33, %35 : vector<16x128xf32>
    %37 = arith.addf %24, %36 : vector<16x128xf32>
    %c29 = arith.constant 29 : index
    %38 = memref.load %arg2[%c29] : memref<81xf32, #tpu.memory_space<smem>>
    %39 = vector.broadcast %38 : f32 to vector<16x128xf32>
    %40 = arith.mulf %33, %39 : vector<16x128xf32>
    %41 = arith.addf %28, %40 : vector<16x128xf32>
    %c56 = arith.constant 56 : index
    %42 = memref.load %arg2[%c56] : memref<81xf32, #tpu.memory_space<smem>>
    %43 = vector.broadcast %42 : f32 to vector<16x128xf32>
    %44 = arith.mulf %33, %43 : vector<16x128xf32>
    %45 = arith.addf %32, %44 : vector<16x128xf32>
    %c0_7 = arith.constant 0 : index
    %c0_8 = arith.constant 0 : index
    %c1_9 = arith.constant 1 : index
    %c0_10 = arith.constant 0 : index
    %46 = vector.load %arg1[%c0_7, %c0_8, %c1_9, %c0_10] : memref<2x3x18x128xf32, #tpu.memory_space<vmem>>, vector<1x1x16x128xf32>
    %47 = vector.shape_cast %46 : vector<1x1x16x128xf32> to vector<16x128xf32>
    %c3 = arith.constant 3 : index
    %48 = memref.load %arg2[%c3] : memref<81xf32, #tpu.memory_space<smem>>
    %49 = vector.broadcast %48 : f32 to vector<16x128xf32>
    %50 = arith.mulf %47, %49 : vector<16x128xf32>
    %51 = arith.addf %37, %50 : vector<16x128xf32>
    %c30 = arith.constant 30 : index
    %52 = memref.load %arg2[%c30] : memref<81xf32, #tpu.memory_space<smem>>
    %53 = vector.broadcast %52 : f32 to vector<16x128xf32>
    %54 = arith.mulf %47, %53 : vector<16x128xf32>
    %55 = arith.addf %41, %54 : vector<16x128xf32>
    %c57 = arith.constant 57 : index
    %56 = memref.load %arg2[%c57] : memref<81xf32, #tpu.memory_space<smem>>
    %57 = vector.broadcast %56 : f32 to vector<16x128xf32>
    %58 = arith.mulf %47, %57 : vector<16x128xf32>
    %59 = arith.addf %45, %58 : vector<16x128xf32>
    %c127_i32_11 = arith.constant 127 : i32
    %60 = tpu.dynamic_rotate %47 by %c127_i32_11 dim 1 : vector<16x128xf32>, i32 -> vector<16x128xf32>
    %c4 = arith.constant 4 : index
    %61 = memref.load %arg2[%c4] : memref<81xf32, #tpu.memory_space<smem>>
    %62 = vector.broadcast %61 : f32 to vector<16x128xf32>
    %63 = arith.mulf %60, %62 : vector<16x128xf32>
    %64 = arith.addf %51, %63 : vector<16x128xf32>
    %c31 = arith.constant 31 : index
    %65 = memref.load %arg2[%c31] : memref<81xf32, #tpu.memory_space<smem>>
    %66 = vector.broadcast %65 : f32 to vector<16x128xf32>
    %67 = arith.mulf %60, %66 : vector<16x128xf32>
    %68 = arith.addf %55, %67 : vector<16x128xf32>
    %c58 = arith.constant 58 : index
    %69 = memref.load %arg2[%c58] : memref<81xf32, #tpu.memory_space<smem>>
    %70 = vector.broadcast %69 : f32 to vector<16x128xf32>
    %71 = arith.mulf %60, %70 : vector<16x128xf32>
    %72 = arith.addf %59, %71 : vector<16x128xf32>
    %c126_i32_12 = arith.constant 126 : i32
    %73 = tpu.dynamic_rotate %47 by %c126_i32_12 dim 1 : vector<16x128xf32>, i32 -> vector<16x128xf32>
    %c5 = arith.constant 5 : index
    %74 = memref.load %arg2[%c5] : memref<81xf32, #tpu.memory_space<smem>>
    %75 = vector.broadcast %74 : f32 to vector<16x128xf32>
    %76 = arith.mulf %73, %75 : vector<16x128xf32>
    %77 = arith.addf %64, %76 : vector<16x128xf32>
    %c32 = arith.constant 32 : index
    %78 = memref.load %arg2[%c32] : memref<81xf32, #tpu.memory_space<smem>>
    %79 = vector.broadcast %78 : f32 to vector<16x128xf32>
    %80 = arith.mulf %73, %79 : vector<16x128xf32>
    %81 = arith.addf %68, %80 : vector<16x128xf32>
    %c59 = arith.constant 59 : index
    %82 = memref.load %arg2[%c59] : memref<81xf32, #tpu.memory_space<smem>>
    %83 = vector.broadcast %82 : f32 to vector<16x128xf32>
    %84 = arith.mulf %73, %83 : vector<16x128xf32>
    %85 = arith.addf %72, %84 : vector<16x128xf32>
    %c0_13 = arith.constant 0 : index
    %c0_14 = arith.constant 0 : index
    %c2_15 = arith.constant 2 : index
    %c0_16 = arith.constant 0 : index
    %86 = vector.load %arg1[%c0_13, %c0_14, %c2_15, %c0_16] : memref<2x3x18x128xf32, #tpu.memory_space<vmem>>, vector<1x1x16x128xf32>
    %87 = vector.shape_cast %86 : vector<1x1x16x128xf32> to vector<16x128xf32>
    %c6 = arith.constant 6 : index
    %88 = memref.load %arg2[%c6] : memref<81xf32, #tpu.memory_space<smem>>
    %89 = vector.broadcast %88 : f32 to vector<16x128xf32>
    %90 = arith.mulf %87, %89 : vector<16x128xf32>
    %91 = arith.addf %77, %90 : vector<16x128xf32>
    %c33 = arith.constant 33 : index
    %92 = memref.load %arg2[%c33] : memref<81xf32, #tpu.memory_space<smem>>
    %93 = vector.broadcast %92 : f32 to vector<16x128xf32>
    %94 = arith.mulf %87, %93 : vector<16x128xf32>
    %95 = arith.addf %81, %94 : vector<16x128xf32>
    %c60 = arith.constant 60 : index
    %96 = memref.load %arg2[%c60] : memref<81xf32, #tpu.memory_space<smem>>
    %97 = vector.broadcast %96 : f32 to vector<16x128xf32>
    %98 = arith.mulf %87, %97 : vector<16x128xf32>
    %99 = arith.addf %85, %98 : vector<16x128xf32>
    %c127_i32_17 = arith.constant 127 : i32
    %100 = tpu.dynamic_rotate %87 by %c127_i32_17 dim 1 : vector<16x128xf32>, i32 -> vector<16x128xf32>
    %c7 = arith.constant 7 : index
    %101 = memref.load %arg2[%c7] : memref<81xf32, #tpu.memory_space<smem>>
    %102 = vector.broadcast %101 : f32 to vector<16x128xf32>
    %103 = arith.mulf %100, %102 : vector<16x128xf32>
    %104 = arith.addf %91, %103 : vector<16x128xf32>
    %c34 = arith.constant 34 : index
    %105 = memref.load %arg2[%c34] : memref<81xf32, #tpu.memory_space<smem>>
    %106 = vector.broadcast %105 : f32 to vector<16x128xf32>
    %107 = arith.mulf %100, %106 : vector<16x128xf32>
    %108 = arith.addf %95, %107 : vector<16x128xf32>
    %c61 = arith.constant 61 : index
    %109 = memref.load %arg2[%c61] : memref<81xf32, #tpu.memory_space<smem>>
    %110 = vector.broadcast %109 : f32 to vector<16x128xf32>
    %111 = arith.mulf %100, %110 : vector<16x128xf32>
    %112 = arith.addf %99, %111 : vector<16x128xf32>
    %c126_i32_18 = arith.constant 126 : i32
    %113 = tpu.dynamic_rotate %87 by %c126_i32_18 dim 1 : vector<16x128xf32>, i32 -> vector<16x128xf32>
    %c8 = arith.constant 8 : index
    %114 = memref.load %arg2[%c8] : memref<81xf32, #tpu.memory_space<smem>>
    %115 = vector.broadcast %114 : f32 to vector<16x128xf32>
    %116 = arith.mulf %113, %115 : vector<16x128xf32>
    %117 = arith.addf %104, %116 : vector<16x128xf32>
    %c35 = arith.constant 35 : index
    %118 = memref.load %arg2[%c35] : memref<81xf32, #tpu.memory_space<smem>>
    %119 = vector.broadcast %118 : f32 to vector<16x128xf32>
    %120 = arith.mulf %113, %119 : vector<16x128xf32>
    %121 = arith.addf %108, %120 : vector<16x128xf32>
    %c62 = arith.constant 62 : index
    %122 = memref.load %arg2[%c62] : memref<81xf32, #tpu.memory_space<smem>>
    %123 = vector.broadcast %122 : f32 to vector<16x128xf32>
    %124 = arith.mulf %113, %123 : vector<16x128xf32>
    %125 = arith.addf %112, %124 : vector<16x128xf32>
    %c0_19 = arith.constant 0 : index
    %c1_20 = arith.constant 1 : index
    %c0_21 = arith.constant 0 : index
    %c0_22 = arith.constant 0 : index
    %126 = vector.load %arg1[%c0_19, %c1_20, %c0_21, %c0_22] : memref<2x3x18x128xf32, #tpu.memory_space<vmem>>, vector<1x1x16x128xf32>
    %127 = vector.shape_cast %126 : vector<1x1x16x128xf32> to vector<16x128xf32>
    %c9 = arith.constant 9 : index
    %128 = memref.load %arg2[%c9] : memref<81xf32, #tpu.memory_space<smem>>
    %129 = vector.broadcast %128 : f32 to vector<16x128xf32>
    %130 = arith.mulf %127, %129 : vector<16x128xf32>
    %131 = arith.addf %117, %130 : vector<16x128xf32>
    %c36 = arith.constant 36 : index
    %132 = memref.load %arg2[%c36] : memref<81xf32, #tpu.memory_space<smem>>
    %133 = vector.broadcast %132 : f32 to vector<16x128xf32>
    %134 = arith.mulf %127, %133 : vector<16x128xf32>
    %135 = arith.addf %121, %134 : vector<16x128xf32>
    %c63 = arith.constant 63 : index
    %136 = memref.load %arg2[%c63] : memref<81xf32, #tpu.memory_space<smem>>
    %137 = vector.broadcast %136 : f32 to vector<16x128xf32>
    %138 = arith.mulf %127, %137 : vector<16x128xf32>
    %139 = arith.addf %125, %138 : vector<16x128xf32>
    %c127_i32_23 = arith.constant 127 : i32
    %140 = tpu.dynamic_rotate %127 by %c127_i32_23 dim 1 : vector<16x128xf32>, i32 -> vector<16x128xf32>
    %c10 = arith.constant 10 : index
    %141 = memref.load %arg2[%c10] : memref<81xf32, #tpu.memory_space<smem>>
    %142 = vector.broadcast %141 : f32 to vector<16x128xf32>
    %143 = arith.mulf %140, %142 : vector<16x128xf32>
    %144 = arith.addf %131, %143 : vector<16x128xf32>
    %c37 = arith.constant 37 : index
    %145 = memref.load %arg2[%c37] : memref<81xf32, #tpu.memory_space<smem>>
    %146 = vector.broadcast %145 : f32 to vector<16x128xf32>
    %147 = arith.mulf %140, %146 : vector<16x128xf32>
    %148 = arith.addf %135, %147 : vector<16x128xf32>
    %c64 = arith.constant 64 : index
    %149 = memref.load %arg2[%c64] : memref<81xf32, #tpu.memory_space<smem>>
    %150 = vector.broadcast %149 : f32 to vector<16x128xf32>
    %151 = arith.mulf %140, %150 : vector<16x128xf32>
    %152 = arith.addf %139, %151 : vector<16x128xf32>
    %c126_i32_24 = arith.constant 126 : i32
    %153 = tpu.dynamic_rotate %127 by %c126_i32_24 dim 1 : vector<16x128xf32>, i32 -> vector<16x128xf32>
    %c11 = arith.constant 11 : index
    %154 = memref.load %arg2[%c11] : memref<81xf32, #tpu.memory_space<smem>>
    %155 = vector.broadcast %154 : f32 to vector<16x128xf32>
    %156 = arith.mulf %153, %155 : vector<16x128xf32>
    %157 = arith.addf %144, %156 : vector<16x128xf32>
    %c38 = arith.constant 38 : index
    %158 = memref.load %arg2[%c38] : memref<81xf32, #tpu.memory_space<smem>>
    %159 = vector.broadcast %158 : f32 to vector<16x128xf32>
    %160 = arith.mulf %153, %159 : vector<16x128xf32>
    %161 = arith.addf %148, %160 : vector<16x128xf32>
    %c65 = arith.constant 65 : index
    %162 = memref.load %arg2[%c65] : memref<81xf32, #tpu.memory_space<smem>>
    %163 = vector.broadcast %162 : f32 to vector<16x128xf32>
    %164 = arith.mulf %153, %163 : vector<16x128xf32>
    %165 = arith.addf %152, %164 : vector<16x128xf32>
    %c0_25 = arith.constant 0 : index
    %c1_26 = arith.constant 1 : index
    %c1_27 = arith.constant 1 : index
    %c0_28 = arith.constant 0 : index
    %166 = vector.load %arg1[%c0_25, %c1_26, %c1_27, %c0_28] : memref<2x3x18x128xf32, #tpu.memory_space<vmem>>, vector<1x1x16x128xf32>
    %167 = vector.shape_cast %166 : vector<1x1x16x128xf32> to vector<16x128xf32>
    %c12 = arith.constant 12 : index
    %168 = memref.load %arg2[%c12] : memref<81xf32, #tpu.memory_space<smem>>
    %169 = vector.broadcast %168 : f32 to vector<16x128xf32>
    %170 = arith.mulf %167, %169 : vector<16x128xf32>
    %171 = arith.addf %157, %170 : vector<16x128xf32>
    %c39 = arith.constant 39 : index
    %172 = memref.load %arg2[%c39] : memref<81xf32, #tpu.memory_space<smem>>
    %173 = vector.broadcast %172 : f32 to vector<16x128xf32>
    %174 = arith.mulf %167, %173 : vector<16x128xf32>
    %175 = arith.addf %161, %174 : vector<16x128xf32>
    %c66 = arith.constant 66 : index
    %176 = memref.load %arg2[%c66] : memref<81xf32, #tpu.memory_space<smem>>
    %177 = vector.broadcast %176 : f32 to vector<16x128xf32>
    %178 = arith.mulf %167, %177 : vector<16x128xf32>
    %179 = arith.addf %165, %178 : vector<16x128xf32>
    %c127_i32_29 = arith.constant 127 : i32
    %180 = tpu.dynamic_rotate %167 by %c127_i32_29 dim 1 : vector<16x128xf32>, i32 -> vector<16x128xf32>
    %c13 = arith.constant 13 : index
    %181 = memref.load %arg2[%c13] : memref<81xf32, #tpu.memory_space<smem>>
    %182 = vector.broadcast %181 : f32 to vector<16x128xf32>
    %183 = arith.mulf %180, %182 : vector<16x128xf32>
    %184 = arith.addf %171, %183 : vector<16x128xf32>
    %c40 = arith.constant 40 : index
    %185 = memref.load %arg2[%c40] : memref<81xf32, #tpu.memory_space<smem>>
    %186 = vector.broadcast %185 : f32 to vector<16x128xf32>
    %187 = arith.mulf %180, %186 : vector<16x128xf32>
    %188 = arith.addf %175, %187 : vector<16x128xf32>
    %c67 = arith.constant 67 : index
    %189 = memref.load %arg2[%c67] : memref<81xf32, #tpu.memory_space<smem>>
    %190 = vector.broadcast %189 : f32 to vector<16x128xf32>
    %191 = arith.mulf %180, %190 : vector<16x128xf32>
    %192 = arith.addf %179, %191 : vector<16x128xf32>
    %c126_i32_30 = arith.constant 126 : i32
    %193 = tpu.dynamic_rotate %167 by %c126_i32_30 dim 1 : vector<16x128xf32>, i32 -> vector<16x128xf32>
    %c14 = arith.constant 14 : index
    %194 = memref.load %arg2[%c14] : memref<81xf32, #tpu.memory_space<smem>>
    %195 = vector.broadcast %194 : f32 to vector<16x128xf32>
    %196 = arith.mulf %193, %195 : vector<16x128xf32>
    %197 = arith.addf %184, %196 : vector<16x128xf32>
    %c41 = arith.constant 41 : index
    %198 = memref.load %arg2[%c41] : memref<81xf32, #tpu.memory_space<smem>>
    %199 = vector.broadcast %198 : f32 to vector<16x128xf32>
    %200 = arith.mulf %193, %199 : vector<16x128xf32>
    %201 = arith.addf %188, %200 : vector<16x128xf32>
    %c68 = arith.constant 68 : index
    %202 = memref.load %arg2[%c68] : memref<81xf32, #tpu.memory_space<smem>>
    %203 = vector.broadcast %202 : f32 to vector<16x128xf32>
    %204 = arith.mulf %193, %203 : vector<16x128xf32>
    %205 = arith.addf %192, %204 : vector<16x128xf32>
    %c0_31 = arith.constant 0 : index
    %c1_32 = arith.constant 1 : index
    %c2_33 = arith.constant 2 : index
    %c0_34 = arith.constant 0 : index
    %206 = vector.load %arg1[%c0_31, %c1_32, %c2_33, %c0_34] : memref<2x3x18x128xf32, #tpu.memory_space<vmem>>, vector<1x1x16x128xf32>
    %207 = vector.shape_cast %206 : vector<1x1x16x128xf32> to vector<16x128xf32>
    %c15 = arith.constant 15 : index
    %208 = memref.load %arg2[%c15] : memref<81xf32, #tpu.memory_space<smem>>
    %209 = vector.broadcast %208 : f32 to vector<16x128xf32>
    %210 = arith.mulf %207, %209 : vector<16x128xf32>
    %211 = arith.addf %197, %210 : vector<16x128xf32>
    %c42 = arith.constant 42 : index
    %212 = memref.load %arg2[%c42] : memref<81xf32, #tpu.memory_space<smem>>
    %213 = vector.broadcast %212 : f32 to vector<16x128xf32>
    %214 = arith.mulf %207, %213 : vector<16x128xf32>
    %215 = arith.addf %201, %214 : vector<16x128xf32>
    %c69 = arith.constant 69 : index
    %216 = memref.load %arg2[%c69] : memref<81xf32, #tpu.memory_space<smem>>
    %217 = vector.broadcast %216 : f32 to vector<16x128xf32>
    %218 = arith.mulf %207, %217 : vector<16x128xf32>
    %219 = arith.addf %205, %218 : vector<16x128xf32>
    %c127_i32_35 = arith.constant 127 : i32
    %220 = tpu.dynamic_rotate %207 by %c127_i32_35 dim 1 : vector<16x128xf32>, i32 -> vector<16x128xf32>
    %c16 = arith.constant 16 : index
    %221 = memref.load %arg2[%c16] : memref<81xf32, #tpu.memory_space<smem>>
    %222 = vector.broadcast %221 : f32 to vector<16x128xf32>
    %223 = arith.mulf %220, %222 : vector<16x128xf32>
    %224 = arith.addf %211, %223 : vector<16x128xf32>
    %c43 = arith.constant 43 : index
    %225 = memref.load %arg2[%c43] : memref<81xf32, #tpu.memory_space<smem>>
    %226 = vector.broadcast %225 : f32 to vector<16x128xf32>
    %227 = arith.mulf %220, %226 : vector<16x128xf32>
    %228 = arith.addf %215, %227 : vector<16x128xf32>
    %c70 = arith.constant 70 : index
    %229 = memref.load %arg2[%c70] : memref<81xf32, #tpu.memory_space<smem>>
    %230 = vector.broadcast %229 : f32 to vector<16x128xf32>
    %231 = arith.mulf %220, %230 : vector<16x128xf32>
    %232 = arith.addf %219, %231 : vector<16x128xf32>
    %c126_i32_36 = arith.constant 126 : i32
    %233 = tpu.dynamic_rotate %207 by %c126_i32_36 dim 1 : vector<16x128xf32>, i32 -> vector<16x128xf32>
    %c17 = arith.constant 17 : index
    %234 = memref.load %arg2[%c17] : memref<81xf32, #tpu.memory_space<smem>>
    %235 = vector.broadcast %234 : f32 to vector<16x128xf32>
    %236 = arith.mulf %233, %235 : vector<16x128xf32>
    %237 = arith.addf %224, %236 : vector<16x128xf32>
    %c44 = arith.constant 44 : index
    %238 = memref.load %arg2[%c44] : memref<81xf32, #tpu.memory_space<smem>>
    %239 = vector.broadcast %238 : f32 to vector<16x128xf32>
    %240 = arith.mulf %233, %239 : vector<16x128xf32>
    %241 = arith.addf %228, %240 : vector<16x128xf32>
    %c71 = arith.constant 71 : index
    %242 = memref.load %arg2[%c71] : memref<81xf32, #tpu.memory_space<smem>>
    %243 = vector.broadcast %242 : f32 to vector<16x128xf32>
    %244 = arith.mulf %233, %243 : vector<16x128xf32>
    %245 = arith.addf %232, %244 : vector<16x128xf32>
    %c0_37 = arith.constant 0 : index
    %c2_38 = arith.constant 2 : index
    %c0_39 = arith.constant 0 : index
    %c0_40 = arith.constant 0 : index
    %246 = vector.load %arg1[%c0_37, %c2_38, %c0_39, %c0_40] : memref<2x3x18x128xf32, #tpu.memory_space<vmem>>, vector<1x1x16x128xf32>
    %247 = vector.shape_cast %246 : vector<1x1x16x128xf32> to vector<16x128xf32>
    %c18 = arith.constant 18 : index
    %248 = memref.load %arg2[%c18] : memref<81xf32, #tpu.memory_space<smem>>
    %249 = vector.broadcast %248 : f32 to vector<16x128xf32>
    %250 = arith.mulf %247, %249 : vector<16x128xf32>
    %251 = arith.addf %237, %250 : vector<16x128xf32>
    %c45 = arith.constant 45 : index
    %252 = memref.load %arg2[%c45] : memref<81xf32, #tpu.memory_space<smem>>
    %253 = vector.broadcast %252 : f32 to vector<16x128xf32>
    %254 = arith.mulf %247, %253 : vector<16x128xf32>
    %255 = arith.addf %241, %254 : vector<16x128xf32>
    %c72 = arith.constant 72 : index
    %256 = memref.load %arg2[%c72] : memref<81xf32, #tpu.memory_space<smem>>
    %257 = vector.broadcast %256 : f32 to vector<16x128xf32>
    %258 = arith.mulf %247, %257 : vector<16x128xf32>
    %259 = arith.addf %245, %258 : vector<16x128xf32>
    %c127_i32_41 = arith.constant 127 : i32
    %260 = tpu.dynamic_rotate %247 by %c127_i32_41 dim 1 : vector<16x128xf32>, i32 -> vector<16x128xf32>
    %c19 = arith.constant 19 : index
    %261 = memref.load %arg2[%c19] : memref<81xf32, #tpu.memory_space<smem>>
    %262 = vector.broadcast %261 : f32 to vector<16x128xf32>
    %263 = arith.mulf %260, %262 : vector<16x128xf32>
    %264 = arith.addf %251, %263 : vector<16x128xf32>
    %c46 = arith.constant 46 : index
    %265 = memref.load %arg2[%c46] : memref<81xf32, #tpu.memory_space<smem>>
    %266 = vector.broadcast %265 : f32 to vector<16x128xf32>
    %267 = arith.mulf %260, %266 : vector<16x128xf32>
    %268 = arith.addf %255, %267 : vector<16x128xf32>
    %c73 = arith.constant 73 : index
    %269 = memref.load %arg2[%c73] : memref<81xf32, #tpu.memory_space<smem>>
    %270 = vector.broadcast %269 : f32 to vector<16x128xf32>
    %271 = arith.mulf %260, %270 : vector<16x128xf32>
    %272 = arith.addf %259, %271 : vector<16x128xf32>
    %c126_i32_42 = arith.constant 126 : i32
    %273 = tpu.dynamic_rotate %247 by %c126_i32_42 dim 1 : vector<16x128xf32>, i32 -> vector<16x128xf32>
    %c20 = arith.constant 20 : index
    %274 = memref.load %arg2[%c20] : memref<81xf32, #tpu.memory_space<smem>>
    %275 = vector.broadcast %274 : f32 to vector<16x128xf32>
    %276 = arith.mulf %273, %275 : vector<16x128xf32>
    %277 = arith.addf %264, %276 : vector<16x128xf32>
    %c47 = arith.constant 47 : index
    %278 = memref.load %arg2[%c47] : memref<81xf32, #tpu.memory_space<smem>>
    %279 = vector.broadcast %278 : f32 to vector<16x128xf32>
    %280 = arith.mulf %273, %279 : vector<16x128xf32>
    %281 = arith.addf %268, %280 : vector<16x128xf32>
    %c74 = arith.constant 74 : index
    %282 = memref.load %arg2[%c74] : memref<81xf32, #tpu.memory_space<smem>>
    %283 = vector.broadcast %282 : f32 to vector<16x128xf32>
    %284 = arith.mulf %273, %283 : vector<16x128xf32>
    %285 = arith.addf %272, %284 : vector<16x128xf32>
    %c0_43 = arith.constant 0 : index
    %c2_44 = arith.constant 2 : index
    %c1_45 = arith.constant 1 : index
    %c0_46 = arith.constant 0 : index
    %286 = vector.load %arg1[%c0_43, %c2_44, %c1_45, %c0_46] : memref<2x3x18x128xf32, #tpu.memory_space<vmem>>, vector<1x1x16x128xf32>
    %287 = vector.shape_cast %286 : vector<1x1x16x128xf32> to vector<16x128xf32>
    %c21 = arith.constant 21 : index
    %288 = memref.load %arg2[%c21] : memref<81xf32, #tpu.memory_space<smem>>
    %289 = vector.broadcast %288 : f32 to vector<16x128xf32>
    %290 = arith.mulf %287, %289 : vector<16x128xf32>
    %291 = arith.addf %277, %290 : vector<16x128xf32>
    %c48 = arith.constant 48 : index
    %292 = memref.load %arg2[%c48] : memref<81xf32, #tpu.memory_space<smem>>
    %293 = vector.broadcast %292 : f32 to vector<16x128xf32>
    %294 = arith.mulf %287, %293 : vector<16x128xf32>
    %295 = arith.addf %281, %294 : vector<16x128xf32>
    %c75 = arith.constant 75 : index
    %296 = memref.load %arg2[%c75] : memref<81xf32, #tpu.memory_space<smem>>
    %297 = vector.broadcast %296 : f32 to vector<16x128xf32>
    %298 = arith.mulf %287, %297 : vector<16x128xf32>
    %299 = arith.addf %285, %298 : vector<16x128xf32>
    %c127_i32_47 = arith.constant 127 : i32
    %300 = tpu.dynamic_rotate %287 by %c127_i32_47 dim 1 : vector<16x128xf32>, i32 -> vector<16x128xf32>
    %c22 = arith.constant 22 : index
    %301 = memref.load %arg2[%c22] : memref<81xf32, #tpu.memory_space<smem>>
    %302 = vector.broadcast %301 : f32 to vector<16x128xf32>
    %303 = arith.mulf %300, %302 : vector<16x128xf32>
    %304 = arith.addf %291, %303 : vector<16x128xf32>
    %c49 = arith.constant 49 : index
    %305 = memref.load %arg2[%c49] : memref<81xf32, #tpu.memory_space<smem>>
    %306 = vector.broadcast %305 : f32 to vector<16x128xf32>
    %307 = arith.mulf %300, %306 : vector<16x128xf32>
    %308 = arith.addf %295, %307 : vector<16x128xf32>
    %c76 = arith.constant 76 : index
    %309 = memref.load %arg2[%c76] : memref<81xf32, #tpu.memory_space<smem>>
    %310 = vector.broadcast %309 : f32 to vector<16x128xf32>
    %311 = arith.mulf %300, %310 : vector<16x128xf32>
    %312 = arith.addf %299, %311 : vector<16x128xf32>
    %c126_i32_48 = arith.constant 126 : i32
    %313 = tpu.dynamic_rotate %287 by %c126_i32_48 dim 1 : vector<16x128xf32>, i32 -> vector<16x128xf32>
    %c23 = arith.constant 23 : index
    %314 = memref.load %arg2[%c23] : memref<81xf32, #tpu.memory_space<smem>>
    %315 = vector.broadcast %314 : f32 to vector<16x128xf32>
    %316 = arith.mulf %313, %315 : vector<16x128xf32>
    %317 = arith.addf %304, %316 : vector<16x128xf32>
    %c50 = arith.constant 50 : index
    %318 = memref.load %arg2[%c50] : memref<81xf32, #tpu.memory_space<smem>>
    %319 = vector.broadcast %318 : f32 to vector<16x128xf32>
    %320 = arith.mulf %313, %319 : vector<16x128xf32>
    %321 = arith.addf %308, %320 : vector<16x128xf32>
    %c77 = arith.constant 77 : index
    %322 = memref.load %arg2[%c77] : memref<81xf32, #tpu.memory_space<smem>>
    %323 = vector.broadcast %322 : f32 to vector<16x128xf32>
    %324 = arith.mulf %313, %323 : vector<16x128xf32>
    %325 = arith.addf %312, %324 : vector<16x128xf32>
    %c0_49 = arith.constant 0 : index
    %c2_50 = arith.constant 2 : index
    %c2_51 = arith.constant 2 : index
    %c0_52 = arith.constant 0 : index
    %326 = vector.load %arg1[%c0_49, %c2_50, %c2_51, %c0_52] : memref<2x3x18x128xf32, #tpu.memory_space<vmem>>, vector<1x1x16x128xf32>
    %327 = vector.shape_cast %326 : vector<1x1x16x128xf32> to vector<16x128xf32>
    %c24 = arith.constant 24 : index
    %328 = memref.load %arg2[%c24] : memref<81xf32, #tpu.memory_space<smem>>
    %329 = vector.broadcast %328 : f32 to vector<16x128xf32>
    %330 = arith.mulf %327, %329 : vector<16x128xf32>
    %331 = arith.addf %317, %330 : vector<16x128xf32>
    %c51 = arith.constant 51 : index
    %332 = memref.load %arg2[%c51] : memref<81xf32, #tpu.memory_space<smem>>
    %333 = vector.broadcast %332 : f32 to vector<16x128xf32>
    %334 = arith.mulf %327, %333 : vector<16x128xf32>
    %335 = arith.addf %321, %334 : vector<16x128xf32>
    %c78 = arith.constant 78 : index
    %336 = memref.load %arg2[%c78] : memref<81xf32, #tpu.memory_space<smem>>
    %337 = vector.broadcast %336 : f32 to vector<16x128xf32>
    %338 = arith.mulf %327, %337 : vector<16x128xf32>
    %339 = arith.addf %325, %338 : vector<16x128xf32>
    %c127_i32_53 = arith.constant 127 : i32
    %340 = tpu.dynamic_rotate %327 by %c127_i32_53 dim 1 : vector<16x128xf32>, i32 -> vector<16x128xf32>
    %c25 = arith.constant 25 : index
    %341 = memref.load %arg2[%c25] : memref<81xf32, #tpu.memory_space<smem>>
    %342 = vector.broadcast %341 : f32 to vector<16x128xf32>
    %343 = arith.mulf %340, %342 : vector<16x128xf32>
    %344 = arith.addf %331, %343 : vector<16x128xf32>
    %c52 = arith.constant 52 : index
    %345 = memref.load %arg2[%c52] : memref<81xf32, #tpu.memory_space<smem>>
    %346 = vector.broadcast %345 : f32 to vector<16x128xf32>
    %347 = arith.mulf %340, %346 : vector<16x128xf32>
    %348 = arith.addf %335, %347 : vector<16x128xf32>
    %c79 = arith.constant 79 : index
    %349 = memref.load %arg2[%c79] : memref<81xf32, #tpu.memory_space<smem>>
    %350 = vector.broadcast %349 : f32 to vector<16x128xf32>
    %351 = arith.mulf %340, %350 : vector<16x128xf32>
    %352 = arith.addf %339, %351 : vector<16x128xf32>
    %c126_i32_54 = arith.constant 126 : i32
    %353 = tpu.dynamic_rotate %327 by %c126_i32_54 dim 1 : vector<16x128xf32>, i32 -> vector<16x128xf32>
    %c26 = arith.constant 26 : index
    %354 = memref.load %arg2[%c26] : memref<81xf32, #tpu.memory_space<smem>>
    %355 = vector.broadcast %354 : f32 to vector<16x128xf32>
    %356 = arith.mulf %353, %355 : vector<16x128xf32>
    %357 = arith.addf %344, %356 : vector<16x128xf32>
    %c53 = arith.constant 53 : index
    %358 = memref.load %arg2[%c53] : memref<81xf32, #tpu.memory_space<smem>>
    %359 = vector.broadcast %358 : f32 to vector<16x128xf32>
    %360 = arith.mulf %353, %359 : vector<16x128xf32>
    %361 = arith.addf %348, %360 : vector<16x128xf32>
    %c80 = arith.constant 80 : index
    %362 = memref.load %arg2[%c80] : memref<81xf32, #tpu.memory_space<smem>>
    %363 = vector.broadcast %362 : f32 to vector<16x128xf32>
    %364 = arith.mulf %353, %363 : vector<16x128xf32>
    %365 = arith.addf %352, %364 : vector<16x128xf32>
    %c0_55 = arith.constant 0 : index
    %c0_56 = arith.constant 0 : index
    %c0_57 = arith.constant 0 : index
    %c0_58 = arith.constant 0 : index
    %366 = vector.load %arg4[%c0_55, %c0_56, %c0_57, %c0_58] : memref<2x3x16x128xf32, #tpu.memory_space<vmem>>, vector<1x1x16x128xf32>
    %367 = vector.shape_cast %366 : vector<1x1x16x128xf32> to vector<16x128xf32>
    %368 = vector.shape_cast %357 : vector<16x128xf32> to vector<1x1x16x128xf32>
    tpu.vector_store %arg4[%c0_55, %c0_56, %c0_57, %c0_58], %368 {strides = array<i32>} : memref<2x3x16x128xf32, #tpu.memory_space<vmem>>, vector<1x1x16x128xf32>,
    %c0_59 = arith.constant 0 : index
    %c1_60 = arith.constant 1 : index
    %c0_61 = arith.constant 0 : index
    %c0_62 = arith.constant 0 : index
    %369 = vector.load %arg4[%c0_59, %c1_60, %c0_61, %c0_62] : memref<2x3x16x128xf32, #tpu.memory_space<vmem>>, vector<1x1x16x128xf32>
    %370 = vector.shape_cast %369 : vector<1x1x16x128xf32> to vector<16x128xf32>
    %371 = vector.shape_cast %361 : vector<16x128xf32> to vector<1x1x16x128xf32>
    tpu.vector_store %arg4[%c0_59, %c1_60, %c0_61, %c0_62], %371 {strides = array<i32>} : memref<2x3x16x128xf32, #tpu.memory_space<vmem>>, vector<1x1x16x128xf32>,
    %c0_63 = arith.constant 0 : index
    %c2_64 = arith.constant 2 : index
    %c0_65 = arith.constant 0 : index
    %c0_66 = arith.constant 0 : index
    %372 = vector.load %arg4[%c0_63, %c2_64, %c0_65, %c0_66] : memref<2x3x16x128xf32, #tpu.memory_space<vmem>>, vector<1x1x16x128xf32>
    %373 = vector.shape_cast %372 : vector<1x1x16x128xf32> to vector<16x128xf32>
    %374 = vector.shape_cast %365 : vector<16x128xf32> to vector<1x1x16x128xf32>
    tpu.vector_store %arg4[%c0_63, %c2_64, %c0_65, %c0_66], %374 {strides = array<i32>} : memref<2x3x16x128xf32, #tpu.memory_space<vmem>>, vector<1x1x16x128xf32>,
    %c0_67 = arith.constant 0 : index
    %375 = memref.load %arg3[%c0_67] : memref<3xf32, #tpu.memory_space<smem>>
    %376 = vector.broadcast %375 : f32 to vector<16x128xf32>
    %c1_68 = arith.constant 1 : index
    %377 = memref.load %arg3[%c1_68] : memref<3xf32, #tpu.memory_space<smem>>
    %378 = vector.broadcast %377 : f32 to vector<16x128xf32>
    %c2_69 = arith.constant 2 : index
    %379 = memref.load %arg3[%c2_69] : memref<3xf32, #tpu.memory_space<smem>>
    %380 = vector.broadcast %379 : f32 to vector<16x128xf32>
    %c1_70 = arith.constant 1 : index
    %c0_71 = arith.constant 0 : index
    %c0_72 = arith.constant 0 : index
    %c0_73 = arith.constant 0 : index
    %381 = vector.load %arg1[%c1_70, %c0_71, %c0_72, %c0_73] : memref<2x3x18x128xf32, #tpu.memory_space<vmem>>, vector<1x1x16x128xf32>
    %382 = vector.shape_cast %381 : vector<1x1x16x128xf32> to vector<16x128xf32>
    %c0_74 = arith.constant 0 : index
    %383 = memref.load %arg2[%c0_74] : memref<81xf32, #tpu.memory_space<smem>>
    %384 = vector.broadcast %383 : f32 to vector<16x128xf32>
    %385 = arith.mulf %382, %384 : vector<16x128xf32>
    %386 = arith.addf %376, %385 : vector<16x128xf32>
    %c27_75 = arith.constant 27 : index
    %387 = memref.load %arg2[%c27_75] : memref<81xf32, #tpu.memory_space<smem>>
    %388 = vector.broadcast %387 : f32 to vector<16x128xf32>
    %389 = arith.mulf %382, %388 : vector<16x128xf32>
    %390 = arith.addf %378, %389 : vector<16x128xf32>
    %c54_76 = arith.constant 54 : index
    %391 = memref.load %arg2[%c54_76] : memref<81xf32, #tpu.memory_space<smem>>
    %392 = vector.broadcast %391 : f32 to vector<16x128xf32>
    %393 = arith.mulf %382, %392 : vector<16x128xf32>
    %394 = arith.addf %380, %393 : vector<16x128xf32>
    %c127_i32_77 = arith.constant 127 : i32
    %395 = tpu.dynamic_rotate %382 by %c127_i32_77 dim 1 : vector<16x128xf32>, i32 -> vector<16x128xf32>
    %c1_78 = arith.constant 1 : index
    %396 = memref.load %arg2[%c1_78] : memref<81xf32, #tpu.memory_space<smem>>
    %397 = vector.broadcast %396 : f32 to vector<16x128xf32>
    %398 = arith.mulf %395, %397 : vector<16x128xf32>
    %399 = arith.addf %386, %398 : vector<16x128xf32>
    %c28_79 = arith.constant 28 : index
    %400 = memref.load %arg2[%c28_79] : memref<81xf32, #tpu.memory_space<smem>>
    %401 = vector.broadcast %400 : f32 to vector<16x128xf32>
    %402 = arith.mulf %395, %401 : vector<16x128xf32>
    %403 = arith.addf %390, %402 : vector<16x128xf32>
    %c55_80 = arith.constant 55 : index
    %404 = memref.load %arg2[%c55_80] : memref<81xf32, #tpu.memory_space<smem>>
    %405 = vector.broadcast %404 : f32 to vector<16x128xf32>
    %406 = arith.mulf %395, %405 : vector<16x128xf32>
    %407 = arith.addf %394, %406 : vector<16x128xf32>
    %c126_i32_81 = arith.constant 126 : i32
    %408 = tpu.dynamic_rotate %382 by %c126_i32_81 dim 1 : vector<16x128xf32>, i32 -> vector<16x128xf32>
    %c2_82 = arith.constant 2 : index
    %409 = memref.load %arg2[%c2_82] : memref<81xf32, #tpu.memory_space<smem>>
    %410 = vector.broadcast %409 : f32 to vector<16x128xf32>
    %411 = arith.mulf %408, %410 : vector<16x128xf32>
    %412 = arith.addf %399, %411 : vector<16x128xf32>
    %c29_83 = arith.constant 29 : index
    %413 = memref.load %arg2[%c29_83] : memref<81xf32, #tpu.memory_space<smem>>
    %414 = vector.broadcast %413 : f32 to vector<16x128xf32>
    %415 = arith.mulf %408, %414 : vector<16x128xf32>
    %416 = arith.addf %403, %415 : vector<16x128xf32>
    %c56_84 = arith.constant 56 : index
    %417 = memref.load %arg2[%c56_84] : memref<81xf32, #tpu.memory_space<smem>>
    %418 = vector.broadcast %417 : f32 to vector<16x128xf32>
    %419 = arith.mulf %408, %418 : vector<16x128xf32>
    %420 = arith.addf %407, %419 : vector<16x128xf32>
    %c1_85 = arith.constant 1 : index
    %c0_86 = arith.constant 0 : index
    %c1_87 = arith.constant 1 : index
    %c0_88 = arith.constant 0 : index
    %421 = vector.load %arg1[%c1_85, %c0_86, %c1_87, %c0_88] : memref<2x3x18x128xf32, #tpu.memory_space<vmem>>, vector<1x1x16x128xf32>
    %422 = vector.shape_cast %421 : vector<1x1x16x128xf32> to vector<16x128xf32>
    %c3_89 = arith.constant 3 : index
    %423 = memref.load %arg2[%c3_89] : memref<81xf32, #tpu.memory_space<smem>>
    %424 = vector.broadcast %423 : f32 to vector<16x128xf32>
    %425 = arith.mulf %422, %424 : vector<16x128xf32>
    %426 = arith.addf %412, %425 : vector<16x128xf32>
    %c30_90 = arith.constant 30 : index
    %427 = memref.load %arg2[%c30_90] : memref<81xf32, #tpu.memory_space<smem>>
    %428 = vector.broadcast %427 : f32 to vector<16x128xf32>
    %429 = arith.mulf %422, %428 : vector<16x128xf32>
    %430 = arith.addf %416, %429 : vector<16x128xf32>
    %c57_91 = arith.constant 57 : index
    %431 = memref.load %arg2[%c57_91] : memref<81xf32, #tpu.memory_space<smem>>
    %432 = vector.broadcast %431 : f32 to vector<16x128xf32>
    %433 = arith.mulf %422, %432 : vector<16x128xf32>
    %434 = arith.addf %420, %433 : vector<16x128xf32>
    %c127_i32_92 = arith.constant 127 : i32
    %435 = tpu.dynamic_rotate %422 by %c127_i32_92 dim 1 : vector<16x128xf32>, i32 -> vector<16x128xf32>
    %c4_93 = arith.constant 4 : index
    %436 = memref.load %arg2[%c4_93] : memref<81xf32, #tpu.memory_space<smem>>
    %437 = vector.broadcast %436 : f32 to vector<16x128xf32>
    %438 = arith.mulf %435, %437 : vector<16x128xf32>
    %439 = arith.addf %426, %438 : vector<16x128xf32>
    %c31_94 = arith.constant 31 : index
    %440 = memref.load %arg2[%c31_94] : memref<81xf32, #tpu.memory_space<smem>>
    %441 = vector.broadcast %440 : f32 to vector<16x128xf32>
    %442 = arith.mulf %435, %441 : vector<16x128xf32>
    %443 = arith.addf %430, %442 : vector<16x128xf32>
    %c58_95 = arith.constant 58 : index
    %444 = memref.load %arg2[%c58_95] : memref<81xf32, #tpu.memory_space<smem>>
    %445 = vector.broadcast %444 : f32 to vector<16x128xf32>
    %446 = arith.mulf %435, %445 : vector<16x128xf32>
    %447 = arith.addf %434, %446 : vector<16x128xf32>
    %c126_i32_96 = arith.constant 126 : i32
    %448 = tpu.dynamic_rotate %422 by %c126_i32_96 dim 1 : vector<16x128xf32>, i32 -> vector<16x128xf32>
    %c5_97 = arith.constant 5 : index
    %449 = memref.load %arg2[%c5_97] : memref<81xf32, #tpu.memory_space<smem>>
    %450 = vector.broadcast %449 : f32 to vector<16x128xf32>
    %451 = arith.mulf %448, %450 : vector<16x128xf32>
    %452 = arith.addf %439, %451 : vector<16x128xf32>
    %c32_98 = arith.constant 32 : index
    %453 = memref.load %arg2[%c32_98] : memref<81xf32, #tpu.memory_space<smem>>
    %454 = vector.broadcast %453 : f32 to vector<16x128xf32>
    %455 = arith.mulf %448, %454 : vector<16x128xf32>
    %456 = arith.addf %443, %455 : vector<16x128xf32>
    %c59_99 = arith.constant 59 : index
    %457 = memref.load %arg2[%c59_99] : memref<81xf32, #tpu.memory_space<smem>>
    %458 = vector.broadcast %457 : f32 to vector<16x128xf32>
    %459 = arith.mulf %448, %458 : vector<16x128xf32>
    %460 = arith.addf %447, %459 : vector<16x128xf32>
    %c1_100 = arith.constant 1 : index
    %c0_101 = arith.constant 0 : index
    %c2_102 = arith.constant 2 : index
    %c0_103 = arith.constant 0 : index
    %461 = vector.load %arg1[%c1_100, %c0_101, %c2_102, %c0_103] : memref<2x3x18x128xf32, #tpu.memory_space<vmem>>, vector<1x1x16x128xf32>
    %462 = vector.shape_cast %461 : vector<1x1x16x128xf32> to vector<16x128xf32>
    %c6_104 = arith.constant 6 : index
    %463 = memref.load %arg2[%c6_104] : memref<81xf32, #tpu.memory_space<smem>>
    %464 = vector.broadcast %463 : f32 to vector<16x128xf32>
    %465 = arith.mulf %462, %464 : vector<16x128xf32>
    %466 = arith.addf %452, %465 : vector<16x128xf32>
    %c33_105 = arith.constant 33 : index
    %467 = memref.load %arg2[%c33_105] : memref<81xf32, #tpu.memory_space<smem>>
    %468 = vector.broadcast %467 : f32 to vector<16x128xf32>
    %469 = arith.mulf %462, %468 : vector<16x128xf32>
    %470 = arith.addf %456, %469 : vector<16x128xf32>
    %c60_106 = arith.constant 60 : index
    %471 = memref.load %arg2[%c60_106] : memref<81xf32, #tpu.memory_space<smem>>
    %472 = vector.broadcast %471 : f32 to vector<16x128xf32>
    %473 = arith.mulf %462, %472 : vector<16x128xf32>
    %474 = arith.addf %460, %473 : vector<16x128xf32>
    %c127_i32_107 = arith.constant 127 : i32
    %475 = tpu.dynamic_rotate %462 by %c127_i32_107 dim 1 : vector<16x128xf32>, i32 -> vector<16x128xf32>
    %c7_108 = arith.constant 7 : index
    %476 = memref.load %arg2[%c7_108] : memref<81xf32, #tpu.memory_space<smem>>
    %477 = vector.broadcast %476 : f32 to vector<16x128xf32>
    %478 = arith.mulf %475, %477 : vector<16x128xf32>
    %479 = arith.addf %466, %478 : vector<16x128xf32>
    %c34_109 = arith.constant 34 : index
    %480 = memref.load %arg2[%c34_109] : memref<81xf32, #tpu.memory_space<smem>>
    %481 = vector.broadcast %480 : f32 to vector<16x128xf32>
    %482 = arith.mulf %475, %481 : vector<16x128xf32>
    %483 = arith.addf %470, %482 : vector<16x128xf32>
    %c61_110 = arith.constant 61 : index
    %484 = memref.load %arg2[%c61_110] : memref<81xf32, #tpu.memory_space<smem>>
    %485 = vector.broadcast %484 : f32 to vector<16x128xf32>
    %486 = arith.mulf %475, %485 : vector<16x128xf32>
    %487 = arith.addf %474, %486 : vector<16x128xf32>
    %c126_i32_111 = arith.constant 126 : i32
    %488 = tpu.dynamic_rotate %462 by %c126_i32_111 dim 1 : vector<16x128xf32>, i32 -> vector<16x128xf32>
    %c8_112 = arith.constant 8 : index
    %489 = memref.load %arg2[%c8_112] : memref<81xf32, #tpu.memory_space<smem>>
    %490 = vector.broadcast %489 : f32 to vector<16x128xf32>
    %491 = arith.mulf %488, %490 : vector<16x128xf32>
    %492 = arith.addf %479, %491 : vector<16x128xf32>
    %c35_113 = arith.constant 35 : index
    %493 = memref.load %arg2[%c35_113] : memref<81xf32, #tpu.memory_space<smem>>
    %494 = vector.broadcast %493 : f32 to vector<16x128xf32>
    %495 = arith.mulf %488, %494 : vector<16x128xf32>
    %496 = arith.addf %483, %495 : vector<16x128xf32>
    %c62_114 = arith.constant 62 : index
    %497 = memref.load %arg2[%c62_114] : memref<81xf32, #tpu.memory_space<smem>>
    %498 = vector.broadcast %497 : f32 to vector<16x128xf32>
    %499 = arith.mulf %488, %498 : vector<16x128xf32>
    %500 = arith.addf %487, %499 : vector<16x128xf32>
    %c1_115 = arith.constant 1 : index
    %c1_116 = arith.constant 1 : index
    %c0_117 = arith.constant 0 : index
    %c0_118 = arith.constant 0 : index
    %501 = vector.load %arg1[%c1_115, %c1_116, %c0_117, %c0_118] : memref<2x3x18x128xf32, #tpu.memory_space<vmem>>, vector<1x1x16x128xf32>
    %502 = vector.shape_cast %501 : vector<1x1x16x128xf32> to vector<16x128xf32>
    %c9_119 = arith.constant 9 : index
    %503 = memref.load %arg2[%c9_119] : memref<81xf32, #tpu.memory_space<smem>>
    %504 = vector.broadcast %503 : f32 to vector<16x128xf32>
    %505 = arith.mulf %502, %504 : vector<16x128xf32>
    %506 = arith.addf %492, %505 : vector<16x128xf32>
    %c36_120 = arith.constant 36 : index
    %507 = memref.load %arg2[%c36_120] : memref<81xf32, #tpu.memory_space<smem>>
    %508 = vector.broadcast %507 : f32 to vector<16x128xf32>
    %509 = arith.mulf %502, %508 : vector<16x128xf32>
    %510 = arith.addf %496, %509 : vector<16x128xf32>
    %c63_121 = arith.constant 63 : index
    %511 = memref.load %arg2[%c63_121] : memref<81xf32, #tpu.memory_space<smem>>
    %512 = vector.broadcast %511 : f32 to vector<16x128xf32>
    %513 = arith.mulf %502, %512 : vector<16x128xf32>
    %514 = arith.addf %500, %513 : vector<16x128xf32>
    %c127_i32_122 = arith.constant 127 : i32
    %515 = tpu.dynamic_rotate %502 by %c127_i32_122 dim 1 : vector<16x128xf32>, i32 -> vector<16x128xf32>
    %c10_123 = arith.constant 10 : index
    %516 = memref.load %arg2[%c10_123] : memref<81xf32, #tpu.memory_space<smem>>
    %517 = vector.broadcast %516 : f32 to vector<16x128xf32>
    %518 = arith.mulf %515, %517 : vector<16x128xf32>
    %519 = arith.addf %506, %518 : vector<16x128xf32>
    %c37_124 = arith.constant 37 : index
    %520 = memref.load %arg2[%c37_124] : memref<81xf32, #tpu.memory_space<smem>>
    %521 = vector.broadcast %520 : f32 to vector<16x128xf32>
    %522 = arith.mulf %515, %521 : vector<16x128xf32>
    %523 = arith.addf %510, %522 : vector<16x128xf32>
    %c64_125 = arith.constant 64 : index
    %524 = memref.load %arg2[%c64_125] : memref<81xf32, #tpu.memory_space<smem>>
    %525 = vector.broadcast %524 : f32 to vector<16x128xf32>
    %526 = arith.mulf %515, %525 : vector<16x128xf32>
    %527 = arith.addf %514, %526 : vector<16x128xf32>
    %c126_i32_126 = arith.constant 126 : i32
    %528 = tpu.dynamic_rotate %502 by %c126_i32_126 dim 1 : vector<16x128xf32>, i32 -> vector<16x128xf32>
    %c11_127 = arith.constant 11 : index
    %529 = memref.load %arg2[%c11_127] : memref<81xf32, #tpu.memory_space<smem>>
    %530 = vector.broadcast %529 : f32 to vector<16x128xf32>
    %531 = arith.mulf %528, %530 : vector<16x128xf32>
    %532 = arith.addf %519, %531 : vector<16x128xf32>
    %c38_128 = arith.constant 38 : index
    %533 = memref.load %arg2[%c38_128] : memref<81xf32, #tpu.memory_space<smem>>
    %534 = vector.broadcast %533 : f32 to vector<16x128xf32>
    %535 = arith.mulf %528, %534 : vector<16x128xf32>
    %536 = arith.addf %523, %535 : vector<16x128xf32>
    %c65_129 = arith.constant 65 : index
    %537 = memref.load %arg2[%c65_129] : memref<81xf32, #tpu.memory_space<smem>>
    %538 = vector.broadcast %537 : f32 to vector<16x128xf32>
    %539 = arith.mulf %528, %538 : vector<16x128xf32>
    %540 = arith.addf %527, %539 : vector<16x128xf32>
    %c1_130 = arith.constant 1 : index
    %c1_131 = arith.constant 1 : index
    %c1_132 = arith.constant 1 : index
    %c0_133 = arith.constant 0 : index
    %541 = vector.load %arg1[%c1_130, %c1_131, %c1_132, %c0_133] : memref<2x3x18x128xf32, #tpu.memory_space<vmem>>, vector<1x1x16x128xf32>
    %542 = vector.shape_cast %541 : vector<1x1x16x128xf32> to vector<16x128xf32>
    %c12_134 = arith.constant 12 : index
    %543 = memref.load %arg2[%c12_134] : memref<81xf32, #tpu.memory_space<smem>>
    %544 = vector.broadcast %543 : f32 to vector<16x128xf32>
    %545 = arith.mulf %542, %544 : vector<16x128xf32>
    %546 = arith.addf %532, %545 : vector<16x128xf32>
    %c39_135 = arith.constant 39 : index
    %547 = memref.load %arg2[%c39_135] : memref<81xf32, #tpu.memory_space<smem>>
    %548 = vector.broadcast %547 : f32 to vector<16x128xf32>
    %549 = arith.mulf %542, %548 : vector<16x128xf32>
    %550 = arith.addf %536, %549 : vector<16x128xf32>
    %c66_136 = arith.constant 66 : index
    %551 = memref.load %arg2[%c66_136] : memref<81xf32, #tpu.memory_space<smem>>
    %552 = vector.broadcast %551 : f32 to vector<16x128xf32>
    %553 = arith.mulf %542, %552 : vector<16x128xf32>
    %554 = arith.addf %540, %553 : vector<16x128xf32>
    %c127_i32_137 = arith.constant 127 : i32
    %555 = tpu.dynamic_rotate %542 by %c127_i32_137 dim 1 : vector<16x128xf32>, i32 -> vector<16x128xf32>
    %c13_138 = arith.constant 13 : index
    %556 = memref.load %arg2[%c13_138] : memref<81xf32, #tpu.memory_space<smem>>
    %557 = vector.broadcast %556 : f32 to vector<16x128xf32>
    %558 = arith.mulf %555, %557 : vector<16x128xf32>
    %559 = arith.addf %546, %558 : vector<16x128xf32>
    %c40_139 = arith.constant 40 : index
    %560 = memref.load %arg2[%c40_139] : memref<81xf32, #tpu.memory_space<smem>>
    %561 = vector.broadcast %560 : f32 to vector<16x128xf32>
    %562 = arith.mulf %555, %561 : vector<16x128xf32>
    %563 = arith.addf %550, %562 : vector<16x128xf32>
    %c67_140 = arith.constant 67 : index
    %564 = memref.load %arg2[%c67_140] : memref<81xf32, #tpu.memory_space<smem>>
    %565 = vector.broadcast %564 : f32 to vector<16x128xf32>
    %566 = arith.mulf %555, %565 : vector<16x128xf32>
    %567 = arith.addf %554, %566 : vector<16x128xf32>
    %c126_i32_141 = arith.constant 126 : i32
    %568 = tpu.dynamic_rotate %542 by %c126_i32_141 dim 1 : vector<16x128xf32>, i32 -> vector<16x128xf32>
    %c14_142 = arith.constant 14 : index
    %569 = memref.load %arg2[%c14_142] : memref<81xf32, #tpu.memory_space<smem>>
    %570 = vector.broadcast %569 : f32 to vector<16x128xf32>
    %571 = arith.mulf %568, %570 : vector<16x128xf32>
    %572 = arith.addf %559, %571 : vector<16x128xf32>
    %c41_143 = arith.constant 41 : index
    %573 = memref.load %arg2[%c41_143] : memref<81xf32, #tpu.memory_space<smem>>
    %574 = vector.broadcast %573 : f32 to vector<16x128xf32>
    %575 = arith.mulf %568, %574 : vector<16x128xf32>
    %576 = arith.addf %563, %575 : vector<16x128xf32>
    %c68_144 = arith.constant 68 : index
    %577 = memref.load %arg2[%c68_144] : memref<81xf32, #tpu.memory_space<smem>>
    %578 = vector.broadcast %577 : f32 to vector<16x128xf32>
    %579 = arith.mulf %568, %578 : vector<16x128xf32>
    %580 = arith.addf %567, %579 : vector<16x128xf32>
    %c1_145 = arith.constant 1 : index
    %c1_146 = arith.constant 1 : index
    %c2_147 = arith.constant 2 : index
    %c0_148 = arith.constant 0 : index
    %581 = vector.load %arg1[%c1_145, %c1_146, %c2_147, %c0_148] : memref<2x3x18x128xf32, #tpu.memory_space<vmem>>, vector<1x1x16x128xf32>
    %582 = vector.shape_cast %581 : vector<1x1x16x128xf32> to vector<16x128xf32>
    %c15_149 = arith.constant 15 : index
    %583 = memref.load %arg2[%c15_149] : memref<81xf32, #tpu.memory_space<smem>>
    %584 = vector.broadcast %583 : f32 to vector<16x128xf32>
    %585 = arith.mulf %582, %584 : vector<16x128xf32>
    %586 = arith.addf %572, %585 : vector<16x128xf32>
    %c42_150 = arith.constant 42 : index
    %587 = memref.load %arg2[%c42_150] : memref<81xf32, #tpu.memory_space<smem>>
    %588 = vector.broadcast %587 : f32 to vector<16x128xf32>
    %589 = arith.mulf %582, %588 : vector<16x128xf32>
    %590 = arith.addf %576, %589 : vector<16x128xf32>
    %c69_151 = arith.constant 69 : index
    %591 = memref.load %arg2[%c69_151] : memref<81xf32, #tpu.memory_space<smem>>
    %592 = vector.broadcast %591 : f32 to vector<16x128xf32>
    %593 = arith.mulf %582, %592 : vector<16x128xf32>
    %594 = arith.addf %580, %593 : vector<16x128xf32>
    %c127_i32_152 = arith.constant 127 : i32
    %595 = tpu.dynamic_rotate %582 by %c127_i32_152 dim 1 : vector<16x128xf32>, i32 -> vector<16x128xf32>
    %c16_153 = arith.constant 16 : index
    %596 = memref.load %arg2[%c16_153] : memref<81xf32, #tpu.memory_space<smem>>
    %597 = vector.broadcast %596 : f32 to vector<16x128xf32>
    %598 = arith.mulf %595, %597 : vector<16x128xf32>
    %599 = arith.addf %586, %598 : vector<16x128xf32>
    %c43_154 = arith.constant 43 : index
    %600 = memref.load %arg2[%c43_154] : memref<81xf32, #tpu.memory_space<smem>>
    %601 = vector.broadcast %600 : f32 to vector<16x128xf32>
    %602 = arith.mulf %595, %601 : vector<16x128xf32>
    %603 = arith.addf %590, %602 : vector<16x128xf32>
    %c70_155 = arith.constant 70 : index
    %604 = memref.load %arg2[%c70_155] : memref<81xf32, #tpu.memory_space<smem>>
    %605 = vector.broadcast %604 : f32 to vector<16x128xf32>
    %606 = arith.mulf %595, %605 : vector<16x128xf32>
    %607 = arith.addf %594, %606 : vector<16x128xf32>
    %c126_i32_156 = arith.constant 126 : i32
    %608 = tpu.dynamic_rotate %582 by %c126_i32_156 dim 1 : vector<16x128xf32>, i32 -> vector<16x128xf32>
    %c17_157 = arith.constant 17 : index
    %609 = memref.load %arg2[%c17_157] : memref<81xf32, #tpu.memory_space<smem>>
    %610 = vector.broadcast %609 : f32 to vector<16x128xf32>
    %611 = arith.mulf %608, %610 : vector<16x128xf32>
    %612 = arith.addf %599, %611 : vector<16x128xf32>
    %c44_158 = arith.constant 44 : index
    %613 = memref.load %arg2[%c44_158] : memref<81xf32, #tpu.memory_space<smem>>
    %614 = vector.broadcast %613 : f32 to vector<16x128xf32>
    %615 = arith.mulf %608, %614 : vector<16x128xf32>
    %616 = arith.addf %603, %615 : vector<16x128xf32>
    %c71_159 = arith.constant 71 : index
    %617 = memref.load %arg2[%c71_159] : memref<81xf32, #tpu.memory_space<smem>>
    %618 = vector.broadcast %617 : f32 to vector<16x128xf32>
    %619 = arith.mulf %608, %618 : vector<16x128xf32>
    %620 = arith.addf %607, %619 : vector<16x128xf32>
    %c1_160 = arith.constant 1 : index
    %c2_161 = arith.constant 2 : index
    %c0_162 = arith.constant 0 : index
    %c0_163 = arith.constant 0 : index
    %621 = vector.load %arg1[%c1_160, %c2_161, %c0_162, %c0_163] : memref<2x3x18x128xf32, #tpu.memory_space<vmem>>, vector<1x1x16x128xf32>
    %622 = vector.shape_cast %621 : vector<1x1x16x128xf32> to vector<16x128xf32>
    %c18_164 = arith.constant 18 : index
    %623 = memref.load %arg2[%c18_164] : memref<81xf32, #tpu.memory_space<smem>>
    %624 = vector.broadcast %623 : f32 to vector<16x128xf32>
    %625 = arith.mulf %622, %624 : vector<16x128xf32>
    %626 = arith.addf %612, %625 : vector<16x128xf32>
    %c45_165 = arith.constant 45 : index
    %627 = memref.load %arg2[%c45_165] : memref<81xf32, #tpu.memory_space<smem>>
    %628 = vector.broadcast %627 : f32 to vector<16x128xf32>
    %629 = arith.mulf %622, %628 : vector<16x128xf32>
    %630 = arith.addf %616, %629 : vector<16x128xf32>
    %c72_166 = arith.constant 72 : index
    %631 = memref.load %arg2[%c72_166] : memref<81xf32, #tpu.memory_space<smem>>
    %632 = vector.broadcast %631 : f32 to vector<16x128xf32>
    %633 = arith.mulf %622, %632 : vector<16x128xf32>
    %634 = arith.addf %620, %633 : vector<16x128xf32>
    %c127_i32_167 = arith.constant 127 : i32
    %635 = tpu.dynamic_rotate %622 by %c127_i32_167 dim 1 : vector<16x128xf32>, i32 -> vector<16x128xf32>
    %c19_168 = arith.constant 19 : index
    %636 = memref.load %arg2[%c19_168] : memref<81xf32, #tpu.memory_space<smem>>
    %637 = vector.broadcast %636 : f32 to vector<16x128xf32>
    %638 = arith.mulf %635, %637 : vector<16x128xf32>
    %639 = arith.addf %626, %638 : vector<16x128xf32>
    %c46_169 = arith.constant 46 : index
    %640 = memref.load %arg2[%c46_169] : memref<81xf32, #tpu.memory_space<smem>>
    %641 = vector.broadcast %640 : f32 to vector<16x128xf32>
    %642 = arith.mulf %635, %641 : vector<16x128xf32>
    %643 = arith.addf %630, %642 : vector<16x128xf32>
    %c73_170 = arith.constant 73 : index
    %644 = memref.load %arg2[%c73_170] : memref<81xf32, #tpu.memory_space<smem>>
    %645 = vector.broadcast %644 : f32 to vector<16x128xf32>
    %646 = arith.mulf %635, %645 : vector<16x128xf32>
    %647 = arith.addf %634, %646 : vector<16x128xf32>
    %c126_i32_171 = arith.constant 126 : i32
    %648 = tpu.dynamic_rotate %622 by %c126_i32_171 dim 1 : vector<16x128xf32>, i32 -> vector<16x128xf32>
    %c20_172 = arith.constant 20 : index
    %649 = memref.load %arg2[%c20_172] : memref<81xf32, #tpu.memory_space<smem>>
    %650 = vector.broadcast %649 : f32 to vector<16x128xf32>
    %651 = arith.mulf %648, %650 : vector<16x128xf32>
    %652 = arith.addf %639, %651 : vector<16x128xf32>
    %c47_173 = arith.constant 47 : index
    %653 = memref.load %arg2[%c47_173] : memref<81xf32, #tpu.memory_space<smem>>
    %654 = vector.broadcast %653 : f32 to vector<16x128xf32>
    %655 = arith.mulf %648, %654 : vector<16x128xf32>
    %656 = arith.addf %643, %655 : vector<16x128xf32>
    %c74_174 = arith.constant 74 : index
    %657 = memref.load %arg2[%c74_174] : memref<81xf32, #tpu.memory_space<smem>>
    %658 = vector.broadcast %657 : f32 to vector<16x128xf32>
    %659 = arith.mulf %648, %658 : vector<16x128xf32>
    %660 = arith.addf %647, %659 : vector<16x128xf32>
    %c1_175 = arith.constant 1 : index
    %c2_176 = arith.constant 2 : index
    %c1_177 = arith.constant 1 : index
    %c0_178 = arith.constant 0 : index
    %661 = vector.load %arg1[%c1_175, %c2_176, %c1_177, %c0_178] : memref<2x3x18x128xf32, #tpu.memory_space<vmem>>, vector<1x1x16x128xf32>
    %662 = vector.shape_cast %661 : vector<1x1x16x128xf32> to vector<16x128xf32>
    %c21_179 = arith.constant 21 : index
    %663 = memref.load %arg2[%c21_179] : memref<81xf32, #tpu.memory_space<smem>>
    %664 = vector.broadcast %663 : f32 to vector<16x128xf32>
    %665 = arith.mulf %662, %664 : vector<16x128xf32>
    %666 = arith.addf %652, %665 : vector<16x128xf32>
    %c48_180 = arith.constant 48 : index
    %667 = memref.load %arg2[%c48_180] : memref<81xf32, #tpu.memory_space<smem>>
    %668 = vector.broadcast %667 : f32 to vector<16x128xf32>
    %669 = arith.mulf %662, %668 : vector<16x128xf32>
    %670 = arith.addf %656, %669 : vector<16x128xf32>
    %c75_181 = arith.constant 75 : index
    %671 = memref.load %arg2[%c75_181] : memref<81xf32, #tpu.memory_space<smem>>
    %672 = vector.broadcast %671 : f32 to vector<16x128xf32>
    %673 = arith.mulf %662, %672 : vector<16x128xf32>
    %674 = arith.addf %660, %673 : vector<16x128xf32>
    %c127_i32_182 = arith.constant 127 : i32
    %675 = tpu.dynamic_rotate %662 by %c127_i32_182 dim 1 : vector<16x128xf32>, i32 -> vector<16x128xf32>
    %c22_183 = arith.constant 22 : index
    %676 = memref.load %arg2[%c22_183] : memref<81xf32, #tpu.memory_space<smem>>
    %677 = vector.broadcast %676 : f32 to vector<16x128xf32>
    %678 = arith.mulf %675, %677 : vector<16x128xf32>
    %679 = arith.addf %666, %678 : vector<16x128xf32>
    %c49_184 = arith.constant 49 : index
    %680 = memref.load %arg2[%c49_184] : memref<81xf32, #tpu.memory_space<smem>>
    %681 = vector.broadcast %680 : f32 to vector<16x128xf32>
    %682 = arith.mulf %675, %681 : vector<16x128xf32>
    %683 = arith.addf %670, %682 : vector<16x128xf32>
    %c76_185 = arith.constant 76 : index
    %684 = memref.load %arg2[%c76_185] : memref<81xf32, #tpu.memory_space<smem>>
    %685 = vector.broadcast %684 : f32 to vector<16x128xf32>
    %686 = arith.mulf %675, %685 : vector<16x128xf32>
    %687 = arith.addf %674, %686 : vector<16x128xf32>
    %c126_i32_186 = arith.constant 126 : i32
    %688 = tpu.dynamic_rotate %662 by %c126_i32_186 dim 1 : vector<16x128xf32>, i32 -> vector<16x128xf32>
    %c23_187 = arith.constant 23 : index
    %689 = memref.load %arg2[%c23_187] : memref<81xf32, #tpu.memory_space<smem>>
    %690 = vector.broadcast %689 : f32 to vector<16x128xf32>
    %691 = arith.mulf %688, %690 : vector<16x128xf32>
    %692 = arith.addf %679, %691 : vector<16x128xf32>
    %c50_188 = arith.constant 50 : index
    %693 = memref.load %arg2[%c50_188] : memref<81xf32, #tpu.memory_space<smem>>
    %694 = vector.broadcast %693 : f32 to vector<16x128xf32>
    %695 = arith.mulf %688, %694 : vector<16x128xf32>
    %696 = arith.addf %683, %695 : vector<16x128xf32>
    %c77_189 = arith.constant 77 : index
    %697 = memref.load %arg2[%c77_189] : memref<81xf32, #tpu.memory_space<smem>>
    %698 = vector.broadcast %697 : f32 to vector<16x128xf32>
    %699 = arith.mulf %688, %698 : vector<16x128xf32>
    %700 = arith.addf %687, %699 : vector<16x128xf32>
    %c1_190 = arith.constant 1 : index
    %c2_191 = arith.constant 2 : index
    %c2_192 = arith.constant 2 : index
    %c0_193 = arith.constant 0 : index
    %701 = vector.load %arg1[%c1_190, %c2_191, %c2_192, %c0_193] : memref<2x3x18x128xf32, #tpu.memory_space<vmem>>, vector<1x1x16x128xf32>
    %702 = vector.shape_cast %701 : vector<1x1x16x128xf32> to vector<16x128xf32>
    %c24_194 = arith.constant 24 : index
    %703 = memref.load %arg2[%c24_194] : memref<81xf32, #tpu.memory_space<smem>>
    %704 = vector.broadcast %703 : f32 to vector<16x128xf32>
    %705 = arith.mulf %702, %704 : vector<16x128xf32>
    %706 = arith.addf %692, %705 : vector<16x128xf32>
    %c51_195 = arith.constant 51 : index
    %707 = memref.load %arg2[%c51_195] : memref<81xf32, #tpu.memory_space<smem>>
    %708 = vector.broadcast %707 : f32 to vector<16x128xf32>
    %709 = arith.mulf %702, %708 : vector<16x128xf32>
    %710 = arith.addf %696, %709 : vector<16x128xf32>
    %c78_196 = arith.constant 78 : index
    %711 = memref.load %arg2[%c78_196] : memref<81xf32, #tpu.memory_space<smem>>
    %712 = vector.broadcast %711 : f32 to vector<16x128xf32>
    %713 = arith.mulf %702, %712 : vector<16x128xf32>
    %714 = arith.addf %700, %713 : vector<16x128xf32>
    %c127_i32_197 = arith.constant 127 : i32
    %715 = tpu.dynamic_rotate %702 by %c127_i32_197 dim 1 : vector<16x128xf32>, i32 -> vector<16x128xf32>
    %c25_198 = arith.constant 25 : index
    %716 = memref.load %arg2[%c25_198] : memref<81xf32, #tpu.memory_space<smem>>
    %717 = vector.broadcast %716 : f32 to vector<16x128xf32>
    %718 = arith.mulf %715, %717 : vector<16x128xf32>
    %719 = arith.addf %706, %718 : vector<16x128xf32>
    %c52_199 = arith.constant 52 : index
    %720 = memref.load %arg2[%c52_199] : memref<81xf32, #tpu.memory_space<smem>>
    %721 = vector.broadcast %720 : f32 to vector<16x128xf32>
    %722 = arith.mulf %715, %721 : vector<16x128xf32>
    %723 = arith.addf %710, %722 : vector<16x128xf32>
    %c79_200 = arith.constant 79 : index
    %724 = memref.load %arg2[%c79_200] : memref<81xf32, #tpu.memory_space<smem>>
    %725 = vector.broadcast %724 : f32 to vector<16x128xf32>
    %726 = arith.mulf %715, %725 : vector<16x128xf32>
    %727 = arith.addf %714, %726 : vector<16x128xf32>
    %c126_i32_201 = arith.constant 126 : i32
    %728 = tpu.dynamic_rotate %702 by %c126_i32_201 dim 1 : vector<16x128xf32>, i32 -> vector<16x128xf32>
    %c26_202 = arith.constant 26 : index
    %729 = memref.load %arg2[%c26_202] : memref<81xf32, #tpu.memory_space<smem>>
    %730 = vector.broadcast %729 : f32 to vector<16x128xf32>
    %731 = arith.mulf %728, %730 : vector<16x128xf32>
    %732 = arith.addf %719, %731 : vector<16x128xf32>
    %c53_203 = arith.constant 53 : index
    %733 = memref.load %arg2[%c53_203] : memref<81xf32, #tpu.memory_space<smem>>
    %734 = vector.broadcast %733 : f32 to vector<16x128xf32>
    %735 = arith.mulf %728, %734 : vector<16x128xf32>
    %736 = arith.addf %723, %735 : vector<16x128xf32>
    %c80_204 = arith.constant 80 : index
    %737 = memref.load %arg2[%c80_204] : memref<81xf32, #tpu.memory_space<smem>>
    %738 = vector.broadcast %737 : f32 to vector<16x128xf32>
    %739 = arith.mulf %728, %738 : vector<16x128xf32>
    %740 = arith.addf %727, %739 : vector<16x128xf32>
    %c1_205 = arith.constant 1 : index
    %c0_206 = arith.constant 0 : index
    %c0_207 = arith.constant 0 : index
    %c0_208 = arith.constant 0 : index
    %741 = vector.load %arg4[%c1_205, %c0_206, %c0_207, %c0_208] : memref<2x3x16x128xf32, #tpu.memory_space<vmem>>, vector<1x1x16x128xf32>
    %742 = vector.shape_cast %741 : vector<1x1x16x128xf32> to vector<16x128xf32>
    %743 = vector.shape_cast %732 : vector<16x128xf32> to vector<1x1x16x128xf32>
    tpu.vector_store %arg4[%c1_205, %c0_206, %c0_207, %c0_208], %743 {strides = array<i32>} : memref<2x3x16x128xf32, #tpu.memory_space<vmem>>, vector<1x1x16x128xf32>,
    %c1_209 = arith.constant 1 : index
    %c1_210 = arith.constant 1 : index
    %c0_211 = arith.constant 0 : index
    %c0_212 = arith.constant 0 : index
    %744 = vector.load %arg4[%c1_209, %c1_210, %c0_211, %c0_212] : memref<2x3x16x128xf32, #tpu.memory_space<vmem>>, vector<1x1x16x128xf32>
    %745 = vector.shape_cast %744 : vector<1x1x16x128xf32> to vector<16x128xf32>
    %746 = vector.shape_cast %736 : vector<16x128xf32> to vector<1x1x16x128xf32>
    tpu.vector_store %arg4[%c1_209, %c1_210, %c0_211, %c0_212], %746 {strides = array<i32>} : memref<2x3x16x128xf32, #tpu.memory_space<vmem>>, vector<1x1x16x128xf32>,
    %c1_213 = arith.constant 1 : index
    %c2_214 = arith.constant 2 : index
    %c0_215 = arith.constant 0 : index
    %c0_216 = arith.constant 0 : index
    %747 = vector.load %arg4[%c1_213, %c2_214, %c0_215, %c0_216] : memref<2x3x16x128xf32, #tpu.memory_space<vmem>>, vector<1x1x16x128xf32>
    %748 = vector.shape_cast %747 : vector<1x1x16x128xf32> to vector<16x128xf32>
    %749 = vector.shape_cast %740 : vector<16x128xf32> to vector<1x1x16x128xf32>
    tpu.vector_store %arg4[%c1_213, %c2_214, %c0_215, %c0_216], %749 {strides = array<i32>} : memref<2x3x16x128xf32, #tpu.memory_space<vmem>>, vector<1x1x16x128xf32>,
    return
  }
  func.func @transform_0(%arg0: i32) -> (i32, i32, i32, i32) {
    %c0_i32 = arith.constant 0 : i32
    %c0_i32_0 = arith.constant 0 : i32
    %c0_i32_1 = arith.constant 0 : i32
    %c0_i32_2 = arith.constant 0 : i32
    %c0_i32_3 = arith.constant 0 : i32
    return %c0_i32, %c0_i32_0, %c0_i32_1, %c0_i32_2 : i32, i32, i32, i32
  }
  func.func @transform_1(%arg0: i32) -> i32 {
    %c0_i32 = arith.constant 0 : i32
    %c0_i32_0 = arith.constant 0 : i32
    return %c0_i32 : i32
  }
  func.func @transform_2(%arg0: i32) -> i32 {
    %c0_i32 = arith.constant 0 : i32
    %c0_i32_0 = arith.constant 0 : i32
    return %c0_i32 : i32
  }
  func.func @transform_3(%arg0: i32) -> (i32, i32, i32, i32) {
    %c0_i32 = arith.constant 0 : i32
    %c0_i32_0 = arith.constant 0 : i32
    %c0_i32_1 = arith.constant 0 : i32
    %c0_i32_2 = arith.constant 0 : i32
    %c0_i32_3 = arith.constant 0 : i32
    return %c0_i32, %c0_i32_0, %c0_i32_1, %c0_i32_2 : i32, i32, i32, i32
  }
}

</mosaic_0001>

<bundles_post_ra>
// kernel: tpu_custom_call.1
= control target key start
LH: loop header
LB: loop body
LE: loop exit
PB: predicated region body
PF: predicated region fallthrough
CT: control target
= control target key end

     0   :  { %s2923_s0 = inlined_call_operand.vmem [shape: f32[2,3,18,128], index: 0, kind: input, shape index: {}]   ;;  %s2924_s1 = inlined_call_operand.vmem [shape: f32[81], index: 1, kind: input, shape index: {}]   ;;  %s2925_s2 = inlined_call_operand.vmem [shape: f32[3], index: 2, kind: input, shape index: {}]   ;;  %s2926_s3 = inlined_call_operand.hbm [shape: f32[2,3,16,128], index: 3, kind: output, shape index: {}]  }
   0x1   :  { %2957 = sst [smem:[#allocation110_spill]] %s2926_s3 }
   0x2   :  { %8 = vsyncpa [#allocation4], 0 }
   0x3   :  { %9 = vsyncpa [#allocation6], 0 }
   0x4   :  { %10 = vsyncpa [#allocation3], 0  ;;  %s19_s14 = sshll.u32 %s2924_s1, 4  ;;  %s29_s17 = sshll.u32 %s2925_s2, 4  ;;  %s20_s14 = int_to_ptr.vmem [resolvable:$true] %s19_s14  ;;  %s30_s17 = int_to_ptr.vmem [resolvable:$true] %s29_s17 }
   0x5   :  { %s1445_s18 = scalar_lea.vmem %s20_s14, 16  ;;  %p1450_p1 = scmp.lt.s32.totalorder %s20_s14, %s20_s14 }
   0x6   :  { %p1446_p0 = scmp.ne.s32.totalorder %s20_s14, %s1445_s18  ;;  %p1451_p2 = scmp.lt.s32.totalorder %s1445_s18, %s1445_s18 }
   0x8   :  { %p1452_p3 = por %p1451_p2, %p1450_p1 }
   0xa   :  { %p1453_p4 = pnand %p1452_p3, %p1446_p0 }
   0xc   :  { %1456 = shalt.err (!%p1453_p4)
}
   0xd   :  { %s1495_s19 = smov [#allocation2]   ;;  %s1457_s20 = scalar_lea.vmem %s30_s17, 16 }
   0xe   :  { %22 = dma.vmem_to_smem %s20_s14, 16, %s1495_s19, [#allocation4]  }
   0xf   :  { %p1458_p5 = scmp.ne.s32.totalorder %s30_s17, %s1457_s20  ;;  %p1462_p6 = scmp.lt.s32.totalorder %s30_s17, %s30_s17 }
  0x10   :  { %p1463_p7 = scmp.lt.s32.totalorder %s1457_s20, %s1457_s20 }
  0x12   :  { %p1464_p8 = por %p1463_p7, %p1462_p6 }
  0x14   :  { %p1465_p9 = pnand %p1464_p8, %p1458_p5 }
  0x16   :  { %1468 = shalt.err (!%p1465_p9)
}
  0x17   :  { %s1496_s1 = smov [#allocation5]  }
  0x18   :  { %32 = dma.vmem_to_smem %s30_s17, 16, %s1496_s1, [#allocation6]  }
  0x19   :  { %1489 = dma.done.wait [#allocation4], 16  }
  0x1a   :  { %1490 = vsyncadd [#allocation4], 4294967280 }
  0x1b   :  { %1491 = dma.done.wait [#allocation6], 16  }
  0x1c   :  { %1492 = vsyncadd [#allocation6], 4294967280 }
  0x1d   :  { %39 = sfence }
  0x1e   :  { %v1531_v0 = vld [vmem:[%s2923_s0] sm:$0xff]  ;;  %s2927_s22 = smov 126   ;;  %s2929_s23 = smov 127   ;;  %v1540_v1 = vld [vmem:[%s2923_s0 + $0x8] sm:$0xff]  ;;  %v1590_v7 = vld [vmem:[%s2923_s0 + $0x18] sm:$0xff] }
  0x1f   :  { %88 = vrot.lane.b32.xlu1 %v1531_v0, %s2927_s22  ;;  %66 = vrot.lane.b32.xlu0 %v1531_v0, %s2929_s23  ;;  %v1549_v2 = vld [vmem:[%s2923_s0 + $0x9] sm:$0xff]  ;;  %v1554_v3 = vld [vmem:[%s2923_s0 + $0x1] sm:$0xff]  ;;  %s1632_s19 = sld [smem:[#allocation2 + $0x2]] }
  0x20   :  { %v1567_v4 = vld [vmem:[%s2923_s0 + $0xa] sm:$0xff]  ;;  %v1572_v5 = vld [vmem:[%s2923_s0 + $0x2] sm:$0xff]  ;;  %s1634_s20 = sld [smem:[#allocation2 + $0x1d]]  ;;  %v1645_v12 = vld [vmem:[%s2923_s0 + $0x52] sm:$0xff] }
  0x21   :  { %v1585_v6 = vld [vmem:[%s2923_s0 + $0x20] sm:$0xff]  ;;  %v1603_v8 = vld [vmem:[%s2923_s0 + $0x50] sm:$0xff]  ;;  %v1608_v9 = vld [vmem:[%s2923_s0 + $0x48] sm:$0xff]  ;;  %s1640_s1 = sld [smem:[#allocation2 + $0x38]] }
  0x22   :  { %v1621_v10 = vld [vmem:[%s2923_s0 + $0x51] sm:$0xff]  ;;  %v1626_v11 = vld [vmem:[%s2923_s0 + $0x49] sm:$0xff]  ;;  %s1652_s26 = sld [smem:[#allocation2]]  ;;  %v1684_v15 = vld [vmem:[%s2923_s0 + $0x60] sm:$0xff] }
  0x23   :  { %90 = vrot.lane.b32.xlu1 %v1540_v1, %s2927_s22  ;;  %68 = vrot.lane.b32.xlu0 %v1540_v1, %s2929_s23  ;;  %v1650_v13 = vld [vmem:[%s2923_s0 + $0x4a] sm:$0xff]  ;;  %s1654_s27 = sld [smem:[#allocation2 + $0x1b]]  ;;  %v1713_v16 = vld [vmem:[%s2923_s0 + $0x21] sm:$0xff] }
  0x24   :  { %s1656_s28 = sld [smem:[#allocation2 + $0x36]]  ;;  %v1679_v14 = vld [vmem:[%s2923_s0 + $0x68] sm:$0xff]  ;;  %v1718_v17 = vld [vmem:[%s2923_s0 + $0x19] sm:$0xff] }
  0x25   :  { %s1662_s29 = sld [smem:[#allocation2 + $0x1]]  ;;  %v1735_v18 = vld [vmem:[%s2923_s0 + $0x69] sm:$0xff]  ;;  %v1740_v19 = vld [vmem:[%s2923_s0 + $0x61] sm:$0xff]  ;;  %v1804_v33 = vstv %s1632_s19 }
  0x26   :  { %s1664_s30 = sld [smem:[#allocation2 + $0x1c]]  ;;  %v1788_v27 = vld [vmem:[%s2923_s0 + $0x22] sm:$0xff]  ;;  %v1793_v28 = vld [vmem:[%s2923_s0 + $0x1a] sm:$0xff]  ;;  %v1807_v34 = vstv %s1634_s20  ;;  %v1845_v44 = vld [vmem:[%s2923_s0 + $0x6a] sm:$0xff] }
  0x27   :  { %132 = vrot.lane.b32.xlu1 %v1549_v2, %s2929_s23  ;;  %130 = vrot.lane.b32.xlu0 %v1554_v3, %s2929_s23  ;;  %s1666_s4 = sld [smem:[#allocation2 + $0x37]]  ;;  %2967 = vst [vmem:[#allocation19_spill] sm:$0xff] %v1807_v34  ;;  %v1813_v36 = vstv %s1640_s1  ;;  %v1850_v45 = vld [vmem:[%s2923_s0 + $0x62] sm:$0xff] }
  0x28   :  { %s1668_s5 = sld [smem:[#allocation5]]  ;;  %v49_v20 = vstv %s1652_s26 }
  0x29   :  { %s1674_s6 = sld [smem:[#allocation5 + $0x1]]  ;;  %v55_v21 = vstv %s1654_s27  ;;  %v50_v23 = vmul.f32 %v49_v20, %v1531_v0  ;;  %v51_v26 = vmul.f32 %v49_v20, %v1540_v1  ;;  %v644_v49 = vmul.f32 %v1603_v8, %v49_v20 }
  0x2a   :  { %s1686_s11 = sld [smem:[#allocation5 + $0x2]]  ;;  %v61_v22 = vstv %s1656_s28  ;;  %v56_v24 = vmul.f32 %v55_v21, %v1531_v0  ;;  %v57_v31 = vmul.f32 %v55_v21, %v1540_v1  ;;  %v650_v53 = vmul.f32 %v1603_v8, %v55_v21 }
  0x2b   :  { %154 = vrot.lane.b32.xlu1 %v1549_v2, %s2927_s22  ;;  %152 = vrot.lane.b32.xlu0 %v1554_v3, %s2927_s22  ;;  %s1688_s12 = sld [smem:[#allocation2 + $0x3]]  ;;  %v62_v25 = vmul.f32 %v61_v22, %v1531_v0  ;;  %v63_v32 = vmul.f32 %v61_v22, %v1540_v1  ;;  %v1816_v37 = vstv %s1662_s29  ;;  %v656_v56 = vmul.f32 %v1603_v8, %v61_v22 }
  0x2c   :  { %s1690_s13 = sld [smem:[#allocation2 + $0x1e]]  ;;  %v1819_v38 = vstv %s1664_s30  ;;  %v643_v57 = vmul.f32 %v1608_v9, %v49_v20  ;;  %v649_v60 = vmul.f32 %v1608_v9, %v55_v21  ;;  %v655_v61 = vmul.f32 %v1608_v9, %v61_v22 }
  0x2d   :  { %s1696_s14 = sld [smem:[#allocation2 + $0x39]]  ;;  %v1891_v58 = vstv %s1666_s4 }
  0x2e   :  { %s1698_s15 = sld [smem:[#allocation2 + $0x4]]  ;;  %v41_v29 = vstv %s1668_s5 }
  0x2f   :  { %196 = vrot.lane.b32.xlu1 %v1567_v4, %s2929_s23  ;;  %194 = vrot.lane.b32.xlu0 %v1572_v5, %s2929_s23  ;;  %s1700_s16 = sld [smem:[#allocation2 + $0x1f]]  ;;  %v1797_v30 = vstv %s1674_s6  ;;  %s2968_s6 = smov 127   ;;  %v1830_v40 = vadd.f32 %v50_v23, %v41_v29  ;;  %v1835_v42 = vadd.f32 %v51_v26, %v41_v29  ;;  %v1909_v1 = vadd.f32 %v644_v49, %v41_v29 }
  0x30   :  { %s1702_s17 = sld [smem:[#allocation2 + $0x3a]]  ;;  %v45_v35 = vstv %s1686_s11  ;;  %v1833_v41 = vadd.f32 %v56_v24, %v1797_v30  ;;  %v1855_v47 = vadd.f32 %v57_v31, %v1797_v30  ;;  %v1921_v20 = vadd.f32 %v650_v53, %v1797_v30 }
  0x31   :  { %s1708_s18 = sld [smem:[#allocation2 + $0x5]]  ;;  %v1822_v39 = vstv %s1688_s12  ;;  %v1852_v46 = vadd.f32 %v62_v25, %v45_v35  ;;  %v1857_v48 = vadd.f32 %v63_v32, %v45_v35  ;;  %2971 = vst [vmem:[#allocation20_spill] sm:$0xff] %v1909_v1  ;;  %v1931_v23 = vadd.f32 %v643_v57, %v41_v29 }
  0x32   :  { %s1720_s7 = sld [smem:[#allocation2 + $0x20]]  ;;  %v1838_v43 = vstv %s1690_s13  ;;  %v1864_v50 = vmul.f32 %v1822_v39, %v1549_v2  ;;  %v1869_v52 = vmul.f32 %v1822_v39, %v1554_v3  ;;  %2972 = vst [vmem:[#allocation21_spill] sm:$0xff] %v1921_v20  ;;  %v1944_v26 = vadd.f32 %v649_v60, %v1797_v30  ;;  %v1989_v60 = vld [vmem:[%s2923_s0 + $0x30] sm:$0xff] }
  0x33   :  { %218 = vrot.lane.b32.xlu1 %v1567_v4, %s2927_s22  ;;  %216 = vrot.lane.b32.xlu0 %v1572_v5, %s2927_s22  ;;  %s1722_s8 = sld [smem:[#allocation2 + $0x3b]]  ;;  %v125_v51 = vstv %s1696_s14  ;;  %v1876_v54 = vmul.f32 %v1838_v43, %v1549_v2  ;;  %v1880_v55 = vmul.f32 %v1838_v43, %v1554_v3  ;;  %2974 = vst [vmem:[#allocation23_spill] sm:$0xff] %v1931_v23 }
  0x34   :  { %s1724_s9 = sld [smem:[#allocation2 + $0x6]]  ;;  %v1894_v59 = vmul.f32 %v125_v51, %v1549_v2  ;;  %v1901_v62 = vstv %s1698_s15  ;;  %v1907_v0 = vmul.f32 %v125_v51, %v1554_v3  ;;  %v1929_v3 = vadd.f32 %v656_v56, %v45_v35  ;;  %2975 = vst [vmem:[#allocation24_spill] sm:$0xff] %v1944_v26 }
  0x35   :  { %s1730_s10 = sld [smem:[#allocation2 + $0x21]]  ;;  %v1904_v63 = vstv %s1700_s16  ;;  %v1946_v31 = vadd.f32 %v655_v61, %v45_v35  ;;  %v1955_v32 = vmul.f32 %v1621_v10, %v1822_v39  ;;  %v1959_v49 = vmul.f32 %v1621_v10, %v1838_v43 }
  0x36   :  { %s1744_s3 = sld [smem:[#allocation2 + $0x7]]  ;;  %v1914_v2 = vstv %s1702_s17  ;;  %2973 = vst [vmem:[#allocation22_spill] sm:$0xff] %v1929_v3  ;;  %v1962_v30 = vmul.f32 %v1621_v10, %v125_v51  ;;  %v1977_v57 = vmul.f32 %v1626_v11, %v1822_v39 }
  0x37   :  { %261 = vrot.lane.b32.xlu1 %v1585_v6, %s2929_s23  ;;  %259 = vrot.lane.b32.xlu0 %v1590_v7, %s2929_s23  ;;  %s1752_s2 = sld [smem:[#allocation2 + $0x3d]]  ;;  %2976 = vst [vmem:[#allocation25_spill] sm:$0xff] %v1946_v31  ;;  %2978 = vst [vmem:[#allocation26_spill] sm:$0xff] %v1955_v32  ;;  %v2016_v31 = vmul.f32 %v1626_v11, %v125_v51 }
  0x38   :  { %s1754_s21 = sld [smem:[#allocation2 + $0x8]]  ;;  %v1926_v21 = vstv %s1720_s7  ;;  %2979 = vst [vmem:[#allocation27_spill] sm:$0xff] %v1959_v49  ;;  %2980 = vst [vmem:[#allocation28_spill] sm:$0xff] %v1962_v30 }
  0x39   :  { %2958 = sst [smem:[#allocation11_spill]] %s1722_s8  ;;  %2981 = vst [vmem:[#allocation29_spill] sm:$0xff] %v1977_v57  ;;  %2987 = vst [vmem:[#allocation31_spill] sm:$0xff] %v2016_v31 }
  0x3a   :  { %s1746_s8 = sld [smem:[#allocation2 + $0x22]] }
  0x3b   :  { %283 = vrot.lane.b32.xlu1 %v1585_v6, %s2927_s22  ;;  %281 = vrot.lane.b32.xlu0 %v1590_v7, %s2927_s22  ;;  %2959 = sst [smem:[#allocation12_spill]] %s1730_s10  ;;  %s2964_s10 = smov 126  }
  0x3c   :  { %s1756_s24 = sld [smem:[#allocation2 + $0x23]]  ;;  %v1995_v39 = vstv %s1744_s3 }
  0x3d   :  { %s1758_s25 = sld [smem:[#allocation2 + $0x3e]] }
  0x3e   :  { %2961 = sst [smem:[#allocation14_spill]] %s1754_s21 }
  0x3f   :  { %661 = vrot.lane.b32.xlu1 %v1603_v8, %s2929_s23  ;;  %659 = vrot.lane.b32.xlu0 %v1608_v9, %s2929_s23  ;;  %s1771_s21 = sld [smem:[#allocation2 + $0x3f]] }
  0x40   :  { %2960 = sst [smem:[#allocation13_spill]] %s1746_s8 }
  0x41   :  { %s1765_s8 = sld [smem:[#allocation2 + $0x9]] }
  0x42   :  { %2962 = sst [smem:[#allocation15_spill]] %s1756_s24 }
  0x43   :  { %683 = vrot.lane.b32.xlu1 %v1603_v8, %s2927_s22  ;;  %681 = vrot.lane.b32.xlu0 %v1608_v9, %s2927_s22  ;;  %2963 = sst [smem:[#allocation16_spill]] %s1758_s25  ;;  %v1917_v8 = vstv %s1708_s18  ;;  %v177_v9 = vstv %s1724_s9 }
  0x44   :  { %s1774_s25 = sld [smem:[#allocation2 + $0xa]]  ;;  %v1951_v29 = vmul.f32 %v177_v9, %v1567_v4  ;;  %v1970_v53 = vmul.f32 %v177_v9, %v1572_v5 }
  0x45   :  { %2965 = sst [smem:[#allocation17_spill]] %s1771_s21 }
  0x46   :  { %s1783_s26 = sld [smem:[#allocation2 + $0x25]] }
  0x47   :  { %725 = vrot.lane.b32.xlu1 %v1621_v10, %s2929_s23  ;;  %723 = vrot.lane.b32.xlu0 %v1626_v11, %s2929_s23  ;;  %s1801_s24 = sld [smem:[#allocation2 + $0x40]]  ;;  %v242_v49 = vstv %s1765_s8 }
  0x48   :  { %s1810_s27 = sld [smem:[#allocation2 + $0xb]]  ;;  %v2047_v31 = vmul.f32 %v1585_v6, %v242_v49  ;;  %v2053_v1 = vmul.f32 %v1590_v7, %v242_v49 }
  0x49   :  { %s1824_s5 = sld [smem:[#allocation2 + $0x26]] }
  0x4a   :  { %2966 = sst [smem:[#allocation18_spill]] %s1774_s25  ;;  %2992 = vst [vmem:[#allocation35_spill] sm:$0xff] %v2047_v31  ;;  %2994 = vst [vmem:[#allocation37_spill] sm:$0xff] %v2053_v1 }
  0x4b   :  { %747 = vrot.lane.b32.xlu1 %v1621_v10, %s2927_s22  ;;  %745 = vrot.lane.b32.xlu0 %v1626_v11, %s2927_s22  ;;  %s1840_s19 = sld [smem:[#allocation2 + $0x41]]  ;;  %v1984_v10 = vld [vmem:[%s2923_s0 + $0x38] sm:$0xff] }
  0x4c   :  { %s1860_s11 = sld [smem:[#allocation2 + $0xc]]  ;;  %v2089_v1 = vstv %s1783_s26 }
  0x4d   :  { %s1872_s12 = sld [smem:[#allocation2 + $0x27]]  ;;  %3000 = vst [vmem:[#allocation43_spill] sm:$0xff] %v2089_v1  ;;  %v2113_v1 = vmul.f32 %v1679_v14, %v242_v49 }
  0x4e   :  { %s1884_s13 = sld [smem:[#allocation2 + $0x42]] }
  0x4f   :  { %789 = vrot.lane.b32.xlu1 %v1645_v12, %s2929_s23  ;;  %787 = vrot.lane.b32.xlu0 %v1650_v13, %s2929_s23  ;;  %s2969_s14 = sld [smem:[#allocation12_spill]]  ;;  %3003 = vst [vmem:[#allocation46_spill] sm:$0xff] %v2113_v1  ;;  %v2132_v1 = vmul.f32 %v1684_v15, %v242_v49 }
  0x50   :  { %s1898_s21 = sld [smem:[#allocation2 + $0xd]] }
  0x51   :  { %s2970_s25 = sld [smem:[#allocation11_spill]]  ;;  %3006 = vst [vmem:[#allocation49_spill] sm:$0xff] %v2132_v1 }
  0x52   :  { %s1911_s4 = sld [smem:[#allocation2 + $0x28]] }
  0x53   :  { %811 = vrot.lane.b32.xlu1 %v1645_v12, %s2927_s22  ;;  %809 = vrot.lane.b32.xlu0 %v1650_v13, %s2927_s22  ;;  %s1923_s15 = sld [smem:[#allocation2 + $0x43]]  ;;  %v312_v31 = vstv %s1872_s12 }
  0x54   :  { %s1933_s16 = sld [smem:[#allocation2 + $0xe]]  ;;  %v2152_v1 = vmul.f32 %v1718_v17, %v312_v31 }
  0x55   :  { %v183_v22 = vstv %s2969_s14  ;;  %s2977_s17 = sld [smem:[#allocation13_spill]] }
  0x56   :  { %s1948_s18 = sld [smem:[#allocation2 + $0x29]]  ;;  %v1967_v35 = vmul.f32 %v183_v22, %v1567_v4  ;;  %v1973_v56 = vmul.f32 %v183_v22, %v1572_v5  ;;  %3011 = vst [vmem:[#allocation54_spill] sm:$0xff] %v2152_v1  ;;  %v2174_v1 = vmul.f32 %v1735_v18, %v312_v31 }
  0x57   :  { %854 = vrot.lane.b32.xlu1 %v1679_v14, %s2929_s23  ;;  %852 = vrot.lane.b32.xlu0 %v1684_v15, %s2929_s23  ;;  %v1940_v24 = vstv %s2970_s25  ;;  %s1979_s7 = sld [smem:[#allocation2 + $0xf]] }
  0x58   :  { %s2982_s20 = sld [smem:[#allocation14_spill]]  ;;  %3017 = vst [vmem:[#allocation60_spill] sm:$0xff] %v2174_v1 }
  0x59   :  { %s2983_s30 = sld [smem:[#allocation15_spill]] }
  0x5a   :  { %s2984_s14 = sld [smem:[#allocation17_spill]] }
  0x5b   :  { %876 = vrot.lane.b32.xlu1 %v1679_v14, %s2927_s22  ;;  %874 = vrot.lane.b32.xlu0 %v1684_v15, %s2927_s22  ;;  %s1742_s22 = sld [smem:[#allocation2 + $0x3c]]  ;;  %v1998_v57 = vstv %s2977_s17 }
  0x5c   :  { %s2985_s25 = sld [smem:[#allocation16_spill]] }
  0x5d   :  { %s2003_s9 = sld [smem:[#allocation2 + $0x2a]] }
  0x5e   :  { %s2018_s3 = sld [smem:[#allocation2 + $0x45]]  ;;  %v2024_v26 = vstv %s2982_s20 }
  0x5f   :  { %325 = vrot.lane.b32.xlu1 %v1713_v16, %s2929_s23  ;;  %323 = vrot.lane.b32.xlu0 %v1718_v17, %s2929_s23  ;;  %v2027_v23 = vstv %s2983_s30  ;;  %s2988_s17 = sld [smem:[#allocation18_spill]] }
  0x60   :  { %v254_v3 = vstv %s2984_s14  ;;  %s2030_s28 = sld [smem:[#allocation2 + $0x10]] }
  0x61   :  { %v189_v25 = vstv %s1742_s22  ;;  %s1964_s22 = sld [smem:[#allocation2 + $0x44]] }
  0x62   :  { %v1992_v61 = vmul.f32 %v189_v25, %v1567_v4  ;;  %v2001_v30 = vmul.f32 %v189_v25, %v1572_v5  ;;  %v2013_v4 = vmul.f32 %v1626_v11, %v1838_v43  ;;  %v2021_v5 = vstv %s1752_s2  ;;  %s2058_s8 = sld [smem:[#allocation2 + $0x46]] }
  0x63   :  { %918 = vrot.lane.b32.xlu1 %v1735_v18, %s2929_s23  ;;  %916 = vrot.lane.b32.xlu0 %v1740_v19, %s2929_s23  ;;  %s1769_s23 = sld [smem:[#allocation2 + $0x24]]  ;;  %v2033_v20 = vstv %s2985_s25  ;;  %v2036_v43 = vmul.f32 %v1645_v12, %v177_v9  ;;  %v2039_v11 = vmul.f32 %v1645_v12, %v183_v22  ;;  %v2042_v51 = vmul.f32 %v1645_v12, %v189_v25 }
  0x64   :  { %2986 = vst [vmem:[#allocation30_spill] sm:$0xff] %v2013_v4  ;;  %v2065_v12 = vmul.f32 %v1585_v6, %v254_v3  ;;  %s2076_s2 = sld [smem:[#allocation2 + $0x11]]  ;;  %v382_v1 = vstv %s2018_s3 }
  0x65   :  { %2989 = vst [vmem:[#allocation32_spill] sm:$0xff] %v2036_v43  ;;  %2990 = vst [vmem:[#allocation33_spill] sm:$0xff] %v2039_v11  ;;  %v2056_v43 = vmul.f32 %v1650_v13, %v177_v9  ;;  %v2081_v11 = vld [vmem:[%s2923_s0 + $0x80] sm:$0xff]  ;;  %s2100_s14 = sld [smem:[#allocation2 + $0x2c]] }
  0x66   :  { %2991 = vst [vmem:[#allocation34_spill] sm:$0xff] %v2042_v51  ;;  %2996 = vst [vmem:[#allocation39_spill] sm:$0xff] %v2065_v12  ;;  %v2068_v51 = vstv %s2988_s17  ;;  %v2092_v12 = vstv %s1801_s24  ;;  %s2110_s25 = sld [smem:[#allocation2 + $0x47]] }
  0x67   :  { %347 = vrot.lane.b32.xlu1 %v1713_v16, %s2964_s10  ;;  %345 = vrot.lane.b32.xlu0 %v1718_v17, %s2964_s10  ;;  %2995 = vst [vmem:[#allocation38_spill] sm:$0xff] %v2056_v43  ;;  %2997 = vst [vmem:[#allocation40_spill] sm:$0xff] %v2068_v51  ;;  %v2074_v43 = vmul.f32 %v1650_v13, %v183_v22  ;;  %v2095_v22 = vmul.f32 %v1590_v7, %v254_v3  ;;  %v2106_v51 = vstv %s1824_s5  ;;  %s2122_s24 = sld [smem:[#allocation2 + $0x12]] }
  0x68   :  { %3001 = vst [vmem:[#allocation44_spill] sm:$0xff] %v2092_v12  ;;  %s2140_s26 = sld [smem:[#allocation2 + $0x2d]] }
  0x69   :  { %v248_v32 = vstv %s1769_s23  ;;  %s2044_s23 = sld [smem:[#allocation2 + $0x2b]]  ;;  %2999 = vst [vmem:[#allocation42_spill] sm:$0xff] %v2074_v43  ;;  %v2098_v43 = vmul.f32 %v1650_v13, %v189_v25  ;;  %v318_v13 = vstv %s1884_s13  ;;  %v2129_v25 = vstv %s1840_s19 }
  0x6a   :  { %v2050_v4 = vmul.f32 %v1585_v6, %v248_v32  ;;  %v2071_v9 = vmul.f32 %v1590_v7, %v248_v32  ;;  %v2086_v6 = vld [vmem:[%s2923_s0 + $0x78] sm:$0xff]  ;;  %v2116_v12 = vmul.f32 %v1679_v14, %v248_v32  ;;  %v2119_v7 = vmul.f32 %v1679_v14, %v254_v3  ;;  %s2168_s5 = sld [smem:[#allocation2 + $0x13]] }
  0x6b   :  { %940 = vrot.lane.b32.xlu1 %v1735_v18, %s2964_s10  ;;  %938 = vrot.lane.b32.xlu0 %v1740_v19, %s2964_s10  ;;  %3002 = vst [vmem:[#allocation45_spill] sm:$0xff] %v2098_v43  ;;  %v2135_v14 = vmul.f32 %v1684_v15, %v248_v32  ;;  %v2146_v43 = vmul.f32 %v1713_v16, %v312_v31  ;;  %s2178_s19 = sld [smem:[#allocation2 + $0x2e]] }
  0x6c   :  { %2993 = vst [vmem:[#allocation36_spill] sm:$0xff] %v2050_v4  ;;  %2998 = vst [vmem:[#allocation41_spill] sm:$0xff] %v2071_v9  ;;  %v2103_v9 = vstv %s1810_s27  ;;  %v306_v4 = vstv %s1860_s11  ;;  %s2154_s27 = sld [smem:[#allocation2 + $0x48]]  ;;  %v2163_v32 = vmul.f32 %v1718_v17, %v318_v13 }
  0x6d   :  { %3004 = vst [vmem:[#allocation47_spill] sm:$0xff] %v2116_v12  ;;  %3005 = vst [vmem:[#allocation48_spill] sm:$0xff] %v2119_v7  ;;  %v2138_v7 = vmul.f32 %v1684_v15, %v254_v3  ;;  %v2143_v12 = vmul.f32 %v1713_v16, %v306_v4  ;;  %v2149_v49 = vmul.f32 %v1718_v17, %v306_v4  ;;  %v2160_v3 = vstv %s1898_s21  ;;  %s2194_s11 = sld [smem:[#allocation2 + $0x49]] }
  0x6e   :  { %3007 = vst [vmem:[#allocation50_spill] sm:$0xff] %v2135_v14  ;;  %3009 = vst [vmem:[#allocation52_spill] sm:$0xff] %v2146_v43  ;;  %v2157_v15 = vmul.f32 %v1713_v16, %v318_v13  ;;  %v2171_v14 = vstv %s1911_s4  ;;  %v370_v16 = vstv %s1979_s7  ;;  %v2185_v17 = vstv %s1923_s15  ;;  %s2208_s12 = sld [smem:[#allocation2 + $0x14]] }
  0x6f   :  { %389 = vrot.lane.b32.xlu1 %v1788_v27, %s2968_s6  ;;  %387 = vrot.lane.b32.xlu0 %v1793_v28, %s2968_s6  ;;  %3008 = vst [vmem:[#allocation51_spill] sm:$0xff] %v2138_v7  ;;  %3010 = vst [vmem:[#allocation53_spill] sm:$0xff] %v2149_v49  ;;  %v2166_v7 = vmul.f32 %v1735_v18, %v306_v4  ;;  %v376_v49 = vstv %s2003_s9  ;;  %v2206_v43 = vstv %s1948_s18  ;;  %s2222_s13 = sld [smem:[#allocation2 + $0x15]]  ;;  %s1499_s18 = smov [#allocation7]  }
  0x70   :  { %3012 = vst [vmem:[#allocation55_spill] sm:$0xff] %v2157_v15  ;;  %3013 = vst [vmem:[#allocation56_spill] sm:$0xff] %v2160_v3  ;;  %v2197_v3 = vmul.f32 %v1740_v19, %v312_v31  ;;  %v2203_v15 = vstv %s1933_s16  ;;  %v2220_v31 = vmul.f32 %v1793_v28, %v370_v16  ;;  %s2236_s21 = sld [smem:[#allocation2 + $0x2f]] }
  0x71   :  { %3014 = vst [vmem:[#allocation57_spill] sm:$0xff] %v2163_v32  ;;  %3015 = vst [vmem:[#allocation58_spill] sm:$0xff] %v2166_v7  ;;  %v2188_v7 = vmul.f32 %v1735_v18, %v318_v13  ;;  %v2200_v32 = vmul.f32 %v1740_v19, %v318_v13  ;;  %v2211_v18 = vstv %s1964_s22  ;;  %v2228_v13 = vmul.f32 %v1793_v28, %v376_v49  ;;  %s2250_s4 = sld [smem:[#allocation2 + $0x30]]  ;;  %s1231_s22 = sshll.u32 %s1499_s18, 4  ;;  %s1232_s22 = int_to_ptr.vmem [resolvable:$true] %s1231_s22 }
  0x72   :  { %3016 = vst [vmem:[#allocation59_spill] sm:$0xff] %v2171_v14  ;;  %3018 = vst [vmem:[#allocation61_spill] sm:$0xff] %v2185_v17  ;;  %v2191_v14 = vmul.f32 %v1740_v19, %v306_v4  ;;  %v2214_v4 = vmul.f32 %v1788_v27, %v370_v16  ;;  %v2225_v19 = vmul.f32 %v1788_v27, %v382_v1  ;;  %s2272_s7 = sld [smem:[#allocation2 + $0x4a]]  ;;  %p1474_p11 = scmp.lt.s32.totalorder %s1232_s22, %s1232_s22 }
  0x73   :  { %982 = vrot.lane.b32.xlu1 %v1845_v44, %s2968_s6  ;;  %980 = vrot.lane.b32.xlu0 %v1850_v45, %s2968_s6  ;;  %3019 = vst [vmem:[#allocation62_spill] sm:$0xff] %v2188_v7  ;;  %3021 = vst [vmem:[#allocation64_spill] sm:$0xff] %v2197_v3  ;;  %s2298_s9 = sld [smem:[#allocation2 + $0x4b]] }
  0x74   :  { %3020 = vst [vmem:[#allocation63_spill] sm:$0xff] %v2191_v14  ;;  %3022 = vst [vmem:[#allocation65_spill] sm:$0xff] %v2200_v32  ;;  %v2217_v14 = vmul.f32 %v1788_v27, %v376_v49  ;;  %v2284_v32 = vstv %s2076_s2  ;;  %s2879_s15 = sld [smem:[#allocation2 + $0x35]] }
  0x75   :  { %3023 = vst [vmem:[#allocation66_spill] sm:$0xff] %v2203_v15  ;;  %3024 = vst [vmem:[#allocation67_spill] sm:$0xff] %v2206_v43  ;;  %v2278_v43 = vstv %s2058_s8  ;;  %v2281_v15 = vmul.f32 %v1850_v45, %v382_v1  ;;  %s2882_s16 = sld [smem:[#allocation2 + $0x50]] }
  0x76   :  { %3025 = vst [vmem:[#allocation68_spill] sm:$0xff] %v2211_v18  ;;  %3026 = vst [vmem:[#allocation69_spill] sm:$0xff] %v2214_v4  ;;  %v2231_v18 = vmul.f32 %v1793_v28, %v382_v1  ;;  %v2234_v4 = vmul.f32 %v1845_v44, %v370_v16 }
  0x77   :  { %411 = vrot.lane.b32.xlu1 %v1788_v27, %s2964_s10  ;;  %409 = vrot.lane.b32.xlu0 %v1793_v28, %s2964_s10  ;;  %3027 = vst [vmem:[#allocation70_spill] sm:$0xff] %v2217_v14  ;;  %3028 = vst [vmem:[#allocation71_spill] sm:$0xff] %v2220_v31  ;;  %v2243_v27 = vmul.f32 %v1845_v44, %v376_v49  ;;  %v2246_v28 = vmul.f32 %v1845_v44, %v382_v1  ;;  %v2260_v31 = vld [vmem:[%s2923_s0 + $0x31] sm:$0xff]  ;;  %v2275_v14 = vstv %s2044_s23 }
  0x78   :  { %3029 = vst [vmem:[#allocation72_spill] sm:$0xff] %v2225_v19  ;;  %3030 = vst [vmem:[#allocation73_spill] sm:$0xff] %v2228_v13  ;;  %v2255_v13 = vld [vmem:[%s2923_s0 + $0x39] sm:$0xff]  ;;  %v2263_v19 = vstv %s2030_s28 }
  0x79   :  { %3031 = vst [vmem:[#allocation74_spill] sm:$0xff] %v2231_v18  ;;  %3032 = vst [vmem:[#allocation75_spill] sm:$0xff] %v2234_v4  ;;  %v435_v18 = vstv %s2122_s24  ;;  %v441_v4 = vstv %s2140_s26  ;;  %s2608_s24 = sld [smem:[#allocation2 + $0x17]] }
  0x7a   :  { %3033 = vst [vmem:[#allocation76_spill] sm:$0xff] %v2243_v27  ;;  %3034 = vst [vmem:[#allocation77_spill] sm:$0xff] %v2246_v28  ;;  %v2269_v28 = vmul.f32 %v1850_v45, %v376_v49  ;;  %v447_v27 = vstv %s2154_s27  ;;  %v2293_v49 = vmul.f32 %v1984_v10, %v441_v4  ;;  %s2612_s26 = sld [smem:[#allocation2 + $0x32]] }
  0x7b   :  { %1004 = vrot.lane.b32.xlu1 %v1845_v44, %s2964_s10  ;;  %1002 = vrot.lane.b32.xlu0 %v1850_v45, %s2964_s10  ;;  %3035 = vst [vmem:[#allocation78_spill] sm:$0xff] %v2263_v19  ;;  %v2266_v44 = vmul.f32 %v1850_v45, %v370_v16  ;;  %3038 = vst [vmem:[#allocation81_spill] sm:$0xff] %v2275_v14  ;;  %v2287_v19 = vstv %s2100_s14  ;;  %v2290_v16 = vmul.f32 %v1984_v10, %v435_v18  ;;  %s2619_s27 = sld [smem:[#allocation2 + $0x4d]] }
  0x7c   :  { %3037 = vst [vmem:[#allocation80_spill] sm:$0xff] %v2269_v28  ;;  %3039 = vst [vmem:[#allocation82_spill] sm:$0xff] %v2278_v43  ;;  %v2296_v28 = vmul.f32 %v1989_v60, %v435_v18  ;;  %v2305_v45 = vstv %s2110_s25  ;;  %v2308_v1 = vmul.f32 %v1984_v10, %v447_v27 }
  0x7d   :  { %3036 = vst [vmem:[#allocation79_spill] sm:$0xff] %v2266_v44  ;;  %3040 = vst [vmem:[#allocation83_spill] sm:$0xff] %v2281_v15  ;;  %v2339_v15 = vmul.f32 %v2086_v6, %v435_v18  ;;  %v2342_v44 = vmul.f32 %v2086_v6, %v441_v4 }
  0x7e   :  { %3041 = vst [vmem:[#allocation84_spill] sm:$0xff] %v2284_v32  ;;  %3042 = vst [vmem:[#allocation85_spill] sm:$0xff] %v2287_v19 }
  0x7f   :  { %454 = vrot.lane.b32.xlu1 %v1984_v10, %s2968_s6  ;;  %452 = vrot.lane.b32.xlu0 %v1989_v60, %s2968_s6  ;;  %3043 = vst [vmem:[#allocation86_spill] sm:$0xff] %v2290_v16  ;;  %3044 = vst [vmem:[#allocation87_spill] sm:$0xff] %v2293_v49  ;;  %v2311_v49 = vmul.f32 %v1989_v60, %v441_v4  ;;  %v2319_v16 = vld [vmem:[%s2923_s0 + $0x81] sm:$0xff] }
  0x80   :  { %3045 = vst [vmem:[#allocation88_spill] sm:$0xff] %v2296_v28  ;;  %3046 = vst [vmem:[#allocation89_spill] sm:$0xff] %v2305_v45  ;;  %v2314_v28 = vmul.f32 %v2081_v11, %v435_v18  ;;  %v2324_v45 = vld [vmem:[%s2923_s0 + $0x79] sm:$0xff] }
  0x81   :  { %3047 = vst [vmem:[#allocation90_spill] sm:$0xff] %v2308_v1  ;;  %3048 = vst [vmem:[#allocation91_spill] sm:$0xff] %v2311_v49  ;;  %v2330_v1 = vmul.f32 %v1989_v60, %v447_v27  ;;  %v2333_v49 = vmul.f32 %v2081_v11, %v441_v4  ;;  %v2370_v4 = vstv %s2250_s4  ;;  %s2831_s4 = sld [smem:[#allocation2 + $0x1a]] }
  0x82   :  { %3049 = vst [vmem:[#allocation92_spill] sm:$0xff] %v2314_v28  ;;  %v2336_v28 = vmul.f32 %v2081_v11, %v447_v27  ;;  %3054 = vst [vmem:[#allocation97_spill] sm:$0xff] %v2339_v15 }
  0x83   :  { %1047 = vrot.lane.b32.xlu1 %v2081_v11, %s2968_s6  ;;  %1045 = vrot.lane.b32.xlu0 %v2086_v6, %s2968_s6  ;;  %3051 = vst [vmem:[#allocation94_spill] sm:$0xff] %v2330_v1  ;;  %3052 = vst [vmem:[#allocation95_spill] sm:$0xff] %v2333_v49  ;;  %v2348_v1 = vstv %s2222_s13  ;;  %s2722_s13 = sld [smem:[#allocation2 + $0x34]] }
  0x84   :  { %3053 = vst [vmem:[#allocation96_spill] sm:$0xff] %v2336_v28  ;;  %3055 = vst [vmem:[#allocation98_spill] sm:$0xff] %v2342_v44  ;;  %v2358_v28 = vstv %s2208_s12  ;;  %s2716_s12 = sld [smem:[#allocation2 + $0x19]] }
  0x85   :  { %3059 = vst [vmem:[#allocation102_spill] sm:$0xff] %v2358_v28  ;;  %v2375_v28 = vstv %s2272_s7  ;;  %s1469_s7 = scalar_lea.vmem %s1232_s22, 1536 }
  0x86   :  { %3061 = vst [vmem:[#allocation104_spill] sm:$0xff] %v2375_v28  ;;  %p1470_p10 = scmp.ne.s32.totalorder %s1232_s22, %s1469_s7  ;;  %p1475_p12 = scmp.lt.s32.totalorder %s1469_s7, %s1469_s7 }
  0x87   :  { %476 = vrot.lane.b32.xlu1 %v1984_v10, %s2964_s10  ;;  %474 = vrot.lane.b32.xlu0 %v1989_v60, %s2964_s10  ;;  %v2327_v10 = vstv %s2168_s5  ;;  %v2345_v60 = vmul.f32 %v2086_v6, %v447_v27  ;;  %s2622_s5 = sld [smem:[#allocation2 + $0x18]] }
  0x88   :  { %3050 = vst [vmem:[#allocation93_spill] sm:$0xff] %v2327_v10  ;;  %v2352_v10 = vstv %s2178_s19  ;;  %s2631_s19 = sld [smem:[#allocation2 + $0x33]]  ;;  %p1476_p13 = por %p1475_p12, %p1474_p11 }
  0x89   :  { %3056 = vst [vmem:[#allocation99_spill] sm:$0xff] %v2345_v60  ;;  %3057 = vst [vmem:[#allocation100_spill] sm:$0xff] %v2352_v10 }
  0x8a   :  { %p1477_p0 = pnand %p1476_p13, %p1470_p10 }
  0x8b   :  { %1069 = vrot.lane.b32.xlu1 %v2081_v11, %s2964_s10  ;;  %1067 = vrot.lane.b32.xlu0 %v2086_v6, %s2964_s10  ;;  %v2355_v11 = vstv %s2194_s11  ;;  %v2367_v6 = vstv %s2236_s21  ;;  %s2636_s11 = sld [smem:[#allocation2 + $0x4e]] }
  0x8c   :  { %3058 = vst [vmem:[#allocation101_spill] sm:$0xff] %v2355_v11  ;;  %3060 = vst [vmem:[#allocation103_spill] sm:$0xff] %v2367_v6  ;;  %s2728_s21 = sld [smem:[#allocation2 + $0x4f]] }
  0x8f   :  { %518 = vrot.lane.b32.xlu1 %v2255_v13, %s2968_s6  ;;  %516 = vrot.lane.b32.xlu0 %v2260_v31, %s2968_s6 }
  0x91   :  { %v89_v19 = vpop.permute.xlu1 %88  ;;  %v67_v32 = vpop.permute.xlu0 %66 }
  0x92   :  { %v72_v49 = vmul.f32 %v1816_v37, %v67_v32  ;;  %v78_v18 = vmul.f32 %v1819_v38, %v67_v32  ;;  %v84_v15 = vmul.f32 %v1891_v58, %v67_v32  ;;  %v94_v27 = vmul.f32 %v1804_v33, %v89_v19 }
  0x93   :  { %1111 = vrot.lane.b32.xlu1 %v2319_v16, %s2968_s6  ;;  %1109 = vrot.lane.b32.xlu0 %v2324_v45, %s2968_s6  ;;  %v2379_v32 = vmul.f32 %v2255_v13, %v2348_v1  ;;  %v100_v44 = vmul.f32 %v1807_v34, %v89_v19  ;;  %v106_v11 = vmul.f32 %v1813_v36, %v89_v19 }
  0x94   :  { %v74_v60 = vadd.f32 %v72_v49, %v1830_v40  ;;  %v80_v10 = vadd.f32 %v78_v18, %v1833_v41  ;;  %v86_v6 = vadd.f32 %v84_v15, %v1852_v46  ;;  %v2387_v40 = vmul.f32 %v2255_v13, %v2370_v4 }
  0x95   :  { %3062 = vst [vmem:[#allocation105_spill] sm:$0xff] %v2379_v32  ;;  %v91_v43 = vpop.permute.xlu1 %90  ;;  %v69_v14 = vpop.permute.xlu0 %68  ;;  %v2390_v49 = vstv %s2298_s9  ;;  %v2394_v32 = vmul.f32 %v2260_v31, %v2348_v1 }
  0x96   :  { %v96_v3 = vadd.f32 %v94_v27, %v74_v60  ;;  %3063 = vst [vmem:[#allocation106_spill] sm:$0xff] %v2387_v40  ;;  %v102_v28 = vadd.f32 %v100_v44, %v80_v10  ;;  %v108_v7 = vadd.f32 %v106_v11, %v86_v6  ;;  %v73_v19 = vmul.f32 %v1816_v37, %v69_v14 }
  0x97   :  { %3064 = vst [vmem:[#allocation107_spill] sm:$0xff] %v2394_v32  ;;  %v79_v41 = vmul.f32 %v1819_v38, %v69_v14  ;;  %540 = vrot.lane.b32.xlu1 %v2255_v13, %s2964_s10  ;;  %v95_v46 = vmul.f32 %v1804_v33, %v91_v43  ;;  %v101_v15 = vmul.f32 %v1807_v34, %v91_v43 }
  0x98   :  { %v85_v60 = vmul.f32 %v1891_v58, %v69_v14  ;;  %538 = vrot.lane.b32.xlu0 %v2260_v31, %s2964_s10  ;;  %v116_v18 = vadd.f32 %v1869_v52, %v96_v3  ;;  %v75_v44 = vadd.f32 %v73_v19, %v1835_v42  ;;  %v122_v27 = vadd.f32 %v1880_v55, %v102_v28 }
  0x99   :  { %v81_v10 = vadd.f32 %v79_v41, %v1855_v47  ;;  %v133_v11 = vpop.permute.xlu1 %132  ;;  %v131_v6 = vpop.permute.xlu0 %130  ;;  %v128_v32 = vadd.f32 %v1907_v0, %v108_v7  ;;  %v107_v40 = vmul.f32 %v1813_v36, %v91_v43  ;;  %v2415_v34 = vmul.f32 %v2260_v31, %v2370_v4  ;;  %v2429_v7 = vld [vmem:[%s2923_s0 + $0x3a] sm:$0xff] }
  0x9a   :  { %v87_v17 = vadd.f32 %v85_v60, %v1857_v48  ;;  %v137_v14 = vmul.f32 %v1901_v62, %v133_v11  ;;  %v97_v52 = vadd.f32 %v95_v46, %v75_v44  ;;  %v136_v47 = vmul.f32 %v1901_v62, %v131_v6 }
  0x9b   :  { %v103_v42 = vadd.f32 %v101_v15, %v81_v10  ;;  %v142_v3 = vmul.f32 %v1904_v63, %v131_v6  ;;  %1133 = vrot.lane.b32.xlu1 %v2319_v16, %s2964_s10  ;;  %v143_v0 = vmul.f32 %v1904_v63, %v133_v11  ;;  %v149_v48 = vmul.f32 %v1914_v2, %v133_v11  ;;  %v2436_v15 = vld [vmem:[%s2923_s0 + $0x32] sm:$0xff] }
  0x9c   :  { %v109_v55 = vadd.f32 %v107_v40, %v87_v17  ;;  %v148_v43 = vmul.f32 %v1914_v2, %v131_v6  ;;  %1131 = vrot.lane.b32.xlu0 %v2324_v45, %s2964_s10  ;;  %v117_v28 = vadd.f32 %v1864_v50, %v97_v52  ;;  %v138_v41 = vadd.f32 %v136_v47, %v116_v18 }
  0x9d   :  { %v123_v19 = vadd.f32 %v1876_v54, %v103_v42  ;;  %v144_v17 = vadd.f32 %v142_v3, %v122_v27  ;;  %v155_v40 = vpop.permute.xlu1 %154  ;;  %v153_v46 = vpop.permute.xlu0 %152 }
  0x9e   :  { %v129_v60 = vadd.f32 %v1894_v59, %v109_v55  ;;  %v150_v44 = vadd.f32 %v148_v43, %v128_v32  ;;  %v159_v10 = vmul.f32 %v1917_v8, %v155_v40  ;;  %v165_v11 = vmul.f32 %v1926_v21, %v155_v40  ;;  %v2452_v59 = vld [vmem:[%s2923_s0 + $0x82] sm:$0xff] }
  0x9f   :  { %v139_v6 = vadd.f32 %v137_v14, %v117_v28  ;;  %v145_v50 = vadd.f32 %v143_v0, %v123_v19  ;;  %v171_v54 = vmul.f32 %v1940_v24, %v155_v40  ;;  %v158_v18 = vmul.f32 %v1917_v8, %v153_v46  ;;  %582 = vrot.lane.b32.xlu1 %v2429_v7, %s2968_s6 }
  0xa0   :  { %v151_v27 = vadd.f32 %v149_v48, %v129_v60  ;;  %v164_v52 = vmul.f32 %v1926_v21, %v153_v46  ;;  %v170_v42 = vmul.f32 %v1940_v24, %v153_v46  ;;  %580 = vrot.lane.b32.xlu0 %v2436_v15, %s2968_s6  ;;  %v2456_v32 = vmul.f32 %v2319_v16, %v2348_v1  ;;  %v2461_v48 = vld [vmem:[%s2923_s0 + $0x7a] sm:$0xff]  ;;  %s2538_s0 = sld [smem:[#allocation2 + $0x16]] }
  0xa1   :  { %v161_v14 = vadd.f32 %v159_v10, %v139_v6  ;;  %v167_v47 = vadd.f32 %v165_v11, %v145_v50  ;;  %v160_v3 = vadd.f32 %v158_v18, %v138_v41  ;;  %v197_v55 = vpop.permute.xlu1 %196  ;;  %v195_v0 = vpop.permute.xlu0 %194  ;;  %v2465_v43 = vmul.f32 %v2255_v13, %v2390_v49 }
  0xa2   :  { %3065 = vst [vmem:[#allocation108_spill] sm:$0xff] %v2456_v32  ;;  %v173_v28 = vadd.f32 %v171_v54, %v151_v27  ;;  %v166_v19 = vadd.f32 %v164_v52, %v144_v17  ;;  %v172_v40 = vadd.f32 %v170_v42, %v150_v44  ;;  %v201_v46 = vmul.f32 %v1995_v39, %v197_v55 }
  0xa3   :  { %v181_v60 = vadd.f32 %v1951_v29, %v161_v14  ;;  %v187_v41 = vadd.f32 %v1967_v35, %v167_v47  ;;  %v207_v10 = vmul.f32 %v1998_v57, %v197_v55  ;;  %v213_v11 = vmul.f32 %v2021_v5, %v197_v55  ;;  %1175 = vrot.lane.b32.xlu1 %v2452_v59, %s2968_s6 }
  0xa4   :  { %v193_v6 = vadd.f32 %v1992_v61, %v173_v28  ;;  %v180_v13 = vadd.f32 %v1970_v53, %v160_v3  ;;  %v186_v17 = vadd.f32 %v1973_v56, %v166_v19  ;;  %v192_v44 = vadd.f32 %v2001_v30, %v172_v40  ;;  %1173 = vrot.lane.b32.xlu0 %v2461_v48, %s2968_s6  ;;  %s2603_s6 = sld [smem:[#allocation2 + $0x4c]] }
  0xa5   :  { %v203_v29 = vadd.f32 %v201_v46, %v181_v60  ;;  %v209_v35 = vadd.f32 %v207_v10, %v187_v41  ;;  %v200_v50 = vmul.f32 %v1995_v39, %v195_v0  ;;  %v206_v54 = vmul.f32 %v1998_v57, %v195_v0  ;;  %v219_v18 = vpop.permute.xlu1 %218  ;;  %v217_v27 = vpop.permute.xlu0 %216 }
  0xa6   :  { %v215_v52 = vadd.f32 %v213_v11, %v193_v6  ;;  %v212_v61 = vmul.f32 %v2021_v5, %v195_v0  ;;  %v223_v53 = vmul.f32 %v2024_v26, %v219_v18  ;;  %v229_v56 = vmul.f32 %v2027_v23, %v219_v18  ;;  %v3067_v6 = vld [vmem:[#allocation35_spill] sm:$0xff] }
  0xa7   :  { %v202_v42 = vadd.f32 %v200_v50, %v180_v13  ;;  %v208_v30 = vadd.f32 %v206_v54, %v186_v17  ;;  %v235_v14 = vmul.f32 %v2033_v20, %v219_v18  ;;  %v222_v47 = vmul.f32 %v2024_v26, %v217_v27  ;;  %604 = vrot.lane.b32.xlu1 %v2429_v7, %s2964_s10  ;;  %v3068_v17 = vld [vmem:[#allocation36_spill] sm:$0xff]  ;;  %v3070_v54 = vld [vmem:[#allocation39_spill] sm:$0xff] }
  0xa8   :  { %v214_v3 = vadd.f32 %v212_v61, %v192_v44  ;;  %v225_v55 = vadd.f32 %v223_v53, %v203_v29  ;;  %v231_v28 = vadd.f32 %v229_v56, %v209_v35  ;;  %v228_v19 = vmul.f32 %v2027_v23, %v217_v27  ;;  %602 = vrot.lane.b32.xlu0 %v2436_v15, %s2964_s10  ;;  %v3069_v29 = vld [vmem:[#allocation40_spill] sm:$0xff] }
  0xa9   :  { %v237_v0 = vadd.f32 %v235_v14, %v215_v52  ;;  %v224_v40 = vadd.f32 %v222_v47, %v202_v42  ;;  %v234_v46 = vmul.f32 %v2033_v20, %v217_v27  ;;  %v262_v60 = vpop.permute.xlu1 %261  ;;  %v260_v41 = vpop.permute.xlu0 %259  ;;  %v2495_v10 = vmul.f32 %v2260_v31, %v2390_v49  ;;  %v3071_v52 = vld [vmem:[#allocation43_spill] sm:$0xff]  ;;  %v3072_v53 = vld [vmem:[#allocation44_spill] sm:$0xff]  ;;  %v3073_v31 = vld [vmem:[#allocation37_spill] sm:$0xff] }
  0xaa   :  { %v230_v11 = vadd.f32 %v228_v19, %v208_v30  ;;  %v246_v13 = vadd.f32 %v3067_v6, %v225_v55  ;;  %v252_v44 = vadd.f32 %v3068_v17, %v231_v28  ;;  %v266_v35 = vmul.f32 %v3069_v29, %v262_v60  ;;  %v3074_v30 = vld [vmem:[#allocation41_spill] sm:$0xff] }
  0xab   :  { %3066 = vst [vmem:[#allocation109_spill] sm:$0xff] %v2495_v10  ;;  %v236_v50 = vadd.f32 %v234_v46, %v214_v3  ;;  %v258_v18 = vadd.f32 %v3070_v54, %v237_v0  ;;  %v272_v61 = vmul.f32 %v3071_v52, %v262_v60  ;;  %v278_v27 = vmul.f32 %v3072_v53, %v262_v60 }
  0xac   :  { %1197 = vrot.lane.b32.xlu1 %v2452_v59, %s2964_s10  ;;  %v268_v56 = vadd.f32 %v266_v35, %v246_v13  ;;  %v245_v42 = vadd.f32 %v3073_v31, %v224_v40  ;;  %v251_v14 = vadd.f32 %v3074_v30, %v230_v11  ;;  %v265_v47 = vmul.f32 %v3069_v29, %v260_v41 }
  0xad   :  { %1195 = vrot.lane.b32.xlu0 %v2461_v48, %s2964_s10  ;;  %v274_v3 = vadd.f32 %v272_v61, %v252_v44  ;;  %v280_v55 = vadd.f32 %v278_v27, %v258_v18  ;;  %v257_v28 = vadd.f32 %v2095_v22, %v236_v50  ;;  %v271_v19 = vmul.f32 %v3071_v52, %v260_v41  ;;  %v284_v0 = vpop.permute.xlu1 %283  ;;  %v282_v46 = vpop.permute.xlu0 %281  ;;  %s2590_s10 = sld [smem:[#allocation2 + $0x31]] }
  0xae   :  { %v267_v60 = vadd.f32 %v265_v47, %v245_v42  ;;  %v277_v6 = vmul.f32 %v3072_v53, %v260_v41  ;;  %v288_v40 = vmul.f32 %v2103_v9, %v284_v0  ;;  %v294_v11 = vmul.f32 %v2106_v51, %v284_v0 }
  0xaf   :  { %v273_v13 = vadd.f32 %v271_v19, %v251_v14  ;;  %v300_v17 = vmul.f32 %v2129_v25, %v284_v0  ;;  %v287_v35 = vmul.f32 %v2103_v9, %v282_v46  ;;  %v293_v44 = vmul.f32 %v2106_v51, %v282_v46 }
  0xb0   :  { %v279_v54 = vadd.f32 %v277_v6, %v257_v28  ;;  %v290_v22 = vadd.f32 %v288_v40, %v268_v56  ;;  %v296_v50 = vadd.f32 %v294_v11, %v274_v3  ;;  %v299_v18 = vmul.f32 %v2129_v25, %v282_v46  ;;  %v3076_v46 = vld [vmem:[#allocation20_spill] sm:$0xff]  ;;  %v3077_v6 = vld [vmem:[#allocation21_spill] sm:$0xff]  ;;  %v3078_v11 = vld [vmem:[#allocation22_spill] sm:$0xff] }
  0xb1   :  { %v302_v61 = vadd.f32 %v300_v17, %v280_v55  ;;  %v289_v27 = vadd.f32 %v287_v35, %v267_v60  ;;  %v295_v31 = vadd.f32 %v293_v44, %v273_v13  ;;  %v662_v41 = vpop.permute.xlu1 %661  ;;  %v660_v42 = vpop.permute.xlu0 %659  ;;  %v2521_v30 = vmul.f32 %v2319_v16, %v2370_v4  ;;  %v3079_v17 = vld [vmem:[#allocation52_spill] sm:$0xff]  ;;  %v3080_v44 = vld [vmem:[#allocation23_spill] sm:$0xff] }
  0xb2   :  { %v301_v14 = vadd.f32 %v299_v18, %v279_v54  ;;  %v666_v47 = vmul.f32 %v662_v41, %v1816_v37  ;;  %v672_v19 = vmul.f32 %v662_v41, %v1819_v38  ;;  %v678_v28 = vmul.f32 %v662_v41, %v1891_v58  ;;  %v3081_v54 = vld [vmem:[#allocation24_spill] sm:$0xff]  ;;  %v3082_v18 = vld [vmem:[#allocation25_spill] sm:$0xff] }
  0xb3   :  { %3075 = vst [vmem:[#allocation35_spill] sm:$0xff] %v2521_v30  ;;  %v665_v56 = vmul.f32 %v660_v42, %v1816_v37  ;;  %v671_v3 = vmul.f32 %v660_v42, %v1819_v38  ;;  %v677_v55 = vmul.f32 %v660_v42, %v1891_v58  ;;  %v2530_v0 = vadd.f32 %v2143_v12, %v290_v22  ;;  %v3083_v22 = vld [vmem:[#allocation55_spill] sm:$0xff] }
  0xb4   :  { %v668_v60 = vadd.f32 %v666_v47, %v3076_v46  ;;  %v674_v40 = vadd.f32 %v672_v19, %v3077_v6  ;;  %v680_v13 = vadd.f32 %v678_v28, %v3078_v11  ;;  %v2536_v35 = vadd.f32 %v3079_v17, %v296_v50  ;;  %v3084_v19 = vld [vmem:[#allocation19_spill] sm:$0xff] }
  0xb5   :  { %v667_v37 = vadd.f32 %v665_v56, %v3080_v44  ;;  %v673_v38 = vadd.f32 %v671_v3, %v3081_v54  ;;  %v679_v58 = vadd.f32 %v677_v55, %v3082_v18  ;;  %v684_v41 = vpop.permute.xlu1 %683  ;;  %v682_v12 = vpop.permute.xlu0 %681  ;;  %v2544_v42 = vadd.f32 %v3083_v22, %v302_v61  ;;  %v3085_v3 = vld [vmem:[#allocation53_spill] sm:$0xff]  ;;  %v3086_v55 = vld [vmem:[#allocation54_spill] sm:$0xff] }
  0xb6   :  { %v688_v47 = vmul.f32 %v684_v41, %v1804_v33  ;;  %v694_v28 = vmul.f32 %v684_v41, %v3084_v19  ;;  %v700_v50 = vmul.f32 %v684_v41, %v1813_v36  ;;  %v687_v46 = vmul.f32 %v682_v12, %v1804_v33  ;;  %v3087_v33 = vld [vmem:[#allocation57_spill] sm:$0xff] }
  0xb7   :  { %v693_v6 = vmul.f32 %v682_v12, %v3084_v19  ;;  %v699_v56 = vmul.f32 %v682_v12, %v1813_v36  ;;  %v2553_v11 = vadd.f32 %v3085_v3, %v289_v27  ;;  %v2556_v17 = vadd.f32 %v3086_v55, %v295_v31  ;;  %v3088_v27 = vld [vmem:[#allocation26_spill] sm:$0xff]  ;;  %v3089_v31 = vld [vmem:[#allocation27_spill] sm:$0xff] }
  0xb8   :  { %v690_v61 = vadd.f32 %v688_v47, %v668_v60  ;;  %v696_v44 = vadd.f32 %v694_v28, %v674_v40  ;;  %v702_v54 = vadd.f32 %v700_v50, %v680_v13  ;;  %v689_v18 = vadd.f32 %v687_v46, %v667_v37  ;;  %v3090_v60 = vld [vmem:[#allocation28_spill] sm:$0xff]  ;;  %v3093_v50 = vld [vmem:[#allocation31_spill] sm:$0xff] }
  0xb9   :  { %v695_v22 = vadd.f32 %v693_v6, %v673_v38  ;;  %v701_v30 = vadd.f32 %v699_v56, %v679_v58  ;;  %v726_v41 = vpop.permute.xlu1 %725  ;;  %v724_v32 = vpop.permute.xlu0 %723  ;;  %v2559_v10 = vadd.f32 %v3087_v33, %v301_v14  ;;  %v2563_v36 = vmul.f32 %v2319_v16, %v2390_v49  ;;  %v3091_v58 = vld [vmem:[#allocation29_spill] sm:$0xff]  ;;  %v3092_v14 = vld [vmem:[#allocation30_spill] sm:$0xff] }
  0xba   :  { %v710_v12 = vadd.f32 %v3088_v27, %v690_v61  ;;  %v716_v19 = vadd.f32 %v3089_v31, %v696_v44  ;;  %v722_v40 = vadd.f32 %v3090_v60, %v702_v54  ;;  %v730_v13 = vmul.f32 %v726_v41, %v1901_v62 }
  0xbb   :  { %v736_v37 = vmul.f32 %v726_v41, %v1904_v63  ;;  %v742_v38 = vmul.f32 %v726_v41, %v1914_v2  ;;  %v709_v47 = vadd.f32 %v3091_v58, %v689_v18  ;;  %v715_v28 = vadd.f32 %v3092_v14, %v695_v22 }
  0xbc   :  { %v721_v46 = vadd.f32 %v3093_v50, %v701_v30  ;;  %v729_v16 = vmul.f32 %v724_v32, %v1901_v62  ;;  %v735_v6 = vmul.f32 %v724_v32, %v1904_v63  ;;  %v2577_v56 = vstv %s2538_s0  ;;  %v3096_v50 = vld [vmem:[#allocation34_spill] sm:$0xff] }
  0xbd   :  { %v732_v3 = vadd.f32 %v730_v13, %v710_v12  ;;  %v738_v55 = vadd.f32 %v736_v37, %v716_v19  ;;  %v741_v61 = vmul.f32 %v724_v32, %v1914_v2  ;;  %v748_v44 = vpop.permute.xlu1 %747  ;;  %v746_v54 = vpop.permute.xlu0 %745  ;;  %v2582_v41 = vmul.f32 %v2324_v45, %v2348_v1 }
  0xbe   :  { %v744_v18 = vadd.f32 %v742_v38, %v722_v40  ;;  %v731_v22 = vadd.f32 %v729_v16, %v709_v47  ;;  %v752_v30 = vmul.f32 %v748_v44, %v1917_v8  ;;  %v758_v62 = vmul.f32 %v748_v44, %v1926_v21 }
  0xbf   :  { %v737_v33 = vadd.f32 %v735_v6, %v715_v28  ;;  %v764_v63 = vmul.f32 %v748_v44, %v1940_v24  ;;  %v751_v27 = vmul.f32 %v746_v54, %v1917_v8  ;;  %v757_v12 = vmul.f32 %v746_v54, %v1926_v21  ;;  %v3094_v8 = vld [vmem:[#allocation32_spill] sm:$0xff]  ;;  %v3095_v21 = vld [vmem:[#allocation33_spill] sm:$0xff]  ;;  %v3097_v6 = vld [vmem:[#allocation38_spill] sm:$0xff] }
  0xc0   :  { %v743_v2 = vadd.f32 %v741_v61, %v721_v46  ;;  %v754_v32 = vadd.f32 %v752_v30, %v732_v3  ;;  %v760_v31 = vadd.f32 %v758_v62, %v738_v55  ;;  %v763_v19 = vmul.f32 %v746_v54, %v1940_v24  ;;  %v3099_v44 = vld [vmem:[#allocation45_spill] sm:$0xff] }
  0xc1   :  { %v766_v1 = vadd.f32 %v764_v63, %v744_v18  ;;  %v753_v60 = vadd.f32 %v751_v27, %v731_v22  ;;  %v759_v40 = vadd.f32 %v757_v12, %v737_v33  ;;  %v790_v13 = vpop.permute.xlu1 %789  ;;  %v788_v37 = vpop.permute.xlu0 %787  ;;  %v2594_v38 = vmul.f32 %v2324_v45, %v2370_v4  ;;  %v3098_v4 = vld [vmem:[#allocation42_spill] sm:$0xff] }
  0xc2   :  { %v765_v58 = vadd.f32 %v763_v19, %v743_v2  ;;  %v774_v47 = vadd.f32 %v3094_v8, %v754_v32  ;;  %v780_v14 = vadd.f32 %v3095_v21, %v760_v31  ;;  %v794_v28 = vmul.f32 %v790_v13, %v1995_v39 }
  0xc3   :  { %v786_v24 = vadd.f32 %v3096_v50, %v766_v1  ;;  %v800_v46 = vmul.f32 %v790_v13, %v1998_v57  ;;  %v806_v16 = vmul.f32 %v790_v13, %v2021_v5  ;;  %v773_v3 = vadd.f32 %v3097_v6, %v753_v60  ;;  %v3101_v50 = vld [vmem:[#allocation47_spill] sm:$0xff] }
  0xc4   :  { %v796_v55 = vadd.f32 %v794_v28, %v774_v47  ;;  %v779_v61 = vadd.f32 %v3098_v4, %v759_v40  ;;  %v785_v54 = vadd.f32 %v3099_v44, %v765_v58  ;;  %v793_v18 = vmul.f32 %v788_v37, %v1995_v39 }
  0xc5   :  { %v802_v22 = vadd.f32 %v800_v46, %v780_v14  ;;  %v808_v30 = vadd.f32 %v806_v16, %v786_v24  ;;  %v799_v62 = vmul.f32 %v788_v37, %v1998_v57  ;;  %v805_v33 = vmul.f32 %v788_v37, %v2021_v5  ;;  %v812_v63 = vpop.permute.xlu1 %811  ;;  %v810_v27 = vpop.permute.xlu0 %809  ;;  %v3100_v14 = vld [vmem:[#allocation46_spill] sm:$0xff]  ;;  %v3102_v24 = vld [vmem:[#allocation48_spill] sm:$0xff] }
  0xc6   :  { %v795_v12 = vadd.f32 %v793_v18, %v773_v3  ;;  %v816_v2 = vmul.f32 %v812_v63, %v2024_v26  ;;  %v822_v32 = vmul.f32 %v812_v63, %v2027_v23  ;;  %v828_v39 = vmul.f32 %v812_v63, %v2033_v20 }
  0xc7   :  { %v801_v31 = vadd.f32 %v799_v62, %v779_v61  ;;  %v807_v19 = vadd.f32 %v805_v33, %v785_v54  ;;  %v815_v1 = vmul.f32 %v810_v27, %v2024_v26  ;;  %v821_v57 = vmul.f32 %v810_v27, %v2027_v23  ;;  %v3105_v61 = vld [vmem:[#allocation51_spill] sm:$0xff] }
  0xc8   :  { %v818_v5 = vadd.f32 %v816_v2, %v796_v55  ;;  %v824_v60 = vadd.f32 %v822_v32, %v802_v22  ;;  %v830_v40 = vadd.f32 %v828_v39, %v808_v30  ;;  %v827_v13 = vmul.f32 %v810_v27, %v2033_v20  ;;  %v3104_v55 = vld [vmem:[#allocation50_spill] sm:$0xff] }
  0xc9   :  { %v817_v37 = vadd.f32 %v815_v1, %v795_v12  ;;  %v823_v58 = vadd.f32 %v821_v57, %v801_v31  ;;  %v855_v8 = vpop.permute.xlu1 %854  ;;  %v853_v47 = vpop.permute.xlu0 %852  ;;  %v2625_v21 = vstv %s2590_s10  ;;  %v2629_v26 = vmul.f32 %v2324_v45, %v2390_v49  ;;  %v3103_v49 = vld [vmem:[#allocation49_spill] sm:$0xff] }
  0xca   :  { %v829_v23 = vadd.f32 %v827_v13, %v807_v19  ;;  %v839_v28 = vadd.f32 %v3100_v14, %v818_v5  ;;  %v845_v20 = vadd.f32 %v3101_v50, %v824_v60  ;;  %v851_v46 = vadd.f32 %v3102_v24, %v830_v40  ;;  %v3106_v50 = vld [vmem:[#allocation56_spill] sm:$0xff]  ;;  %v3107_v24 = vld [vmem:[#allocation58_spill] sm:$0xff] }
  0xcb   :  { %v859_v16 = vmul.f32 %v855_v8, %v3069_v29  ;;  %v865_v6 = vmul.f32 %v855_v8, %v3071_v52  ;;  %v871_v45 = vmul.f32 %v855_v8, %v3072_v53  ;;  %v838_v3 = vadd.f32 %v3103_v49, %v817_v37 }
  0xcc   :  { %v844_v4 = vadd.f32 %v3104_v55, %v823_v58  ;;  %v850_v44 = vadd.f32 %v3105_v61, %v829_v23  ;;  %v858_v54 = vmul.f32 %v853_v47, %v3069_v29  ;;  %v2646_v18 = vstv %s2603_s6 }
  0xcd   :  { %v864_v22 = vmul.f32 %v853_v47, %v3071_v52  ;;  %v870_v30 = vmul.f32 %v853_v47, %v3072_v53  ;;  %v877_v62 = vpop.permute.xlu1 %876  ;;  %v875_v33 = vpop.permute.xlu0 %874  ;;  %v2651_v63 = vstv %s2608_s24  ;;  %v2654_v27 = vstv %s2612_s26 }
  0xce   :  { %v861_v12 = vadd.f32 %v859_v16, %v839_v28  ;;  %v867_v2 = vadd.f32 %v865_v6, %v845_v20  ;;  %v881_v32 = vmul.f32 %v877_v62, %v2103_v9  ;;  %v887_v39 = vmul.f32 %v877_v62, %v2106_v51  ;;  %v3109_v6 = vld [vmem:[#allocation61_spill] sm:$0xff] }
  0xcf   :  { %v873_v29 = vadd.f32 %v871_v45, %v851_v46  ;;  %v893_v52 = vmul.f32 %v877_v62, %v2129_v25  ;;  %v880_v53 = vmul.f32 %v875_v33, %v2103_v9  ;;  %v886_v31 = vmul.f32 %v875_v33, %v2106_v51  ;;  %v3108_v46 = vld [vmem:[#allocation59_spill] sm:$0xff] }
  0xd0   :  { %v860_v19 = vadd.f32 %v858_v54, %v838_v3  ;;  %v883_v1 = vadd.f32 %v881_v32, %v861_v12  ;;  %v889_v57 = vadd.f32 %v887_v39, %v867_v2  ;;  %v892_v5 = vmul.f32 %v875_v33, %v2129_v25  ;;  %v3110_v3 = vld [vmem:[#allocation60_spill] sm:$0xff]  ;;  %v3112_v33 = vld [vmem:[#allocation63_spill] sm:$0xff] }
  0xd1   :  { %v866_v60 = vadd.f32 %v864_v22, %v844_v4  ;;  %v872_v40 = vadd.f32 %v870_v30, %v850_v44  ;;  %v895_v13 = vadd.f32 %v893_v52, %v873_v29  ;;  %v326_v37 = vpop.permute.xlu1 %325  ;;  %v324_v58 = vpop.permute.xlu0 %323  ;;  %v2663_v8 = vstv %s2619_s27  ;;  %v3111_v44 = vld [vmem:[#allocation62_spill] sm:$0xff] }
  0xd2   :  { %v882_v47 = vadd.f32 %v880_v53, %v860_v19  ;;  %v2666_v23 = vstv %s2622_s5  ;;  %v2669_v14 = vstv %s2631_s19  ;;  %v2672_v9 = vstv %s2636_s11  ;;  %v3115_v53 = vld [vmem:[#allocation64_spill] sm:$0xff]  ;;  %v3116_v19 = vld [vmem:[#allocation65_spill] sm:$0xff] }
  0xd3   :  { %v888_v51 = vadd.f32 %v886_v31, %v866_v60  ;;  %v894_v28 = vadd.f32 %v892_v5, %v872_v40  ;;  %v330_v20 = vmul.f32 %v3106_v50, %v326_v37  ;;  %v903_v25 = vadd.f32 %v3107_v24, %v883_v1  ;;  %v3119_v24 = vld [vmem:[#allocation68_spill] sm:$0xff] }
  0xd4   :  { %v336_v16 = vmul.f32 %v3108_v46, %v326_v37  ;;  %v342_v45 = vmul.f32 %v3109_v6, %v326_v37  ;;  %v329_v49 = vmul.f32 %v3106_v50, %v324_v58  ;;  %v909_v55 = vadd.f32 %v3110_v3, %v889_v57 }
  0xd5   :  { %v335_v4 = vmul.f32 %v3108_v46, %v324_v58  ;;  %v341_v61 = vmul.f32 %v3109_v6, %v324_v58  ;;  %v915_v54 = vadd.f32 %v3111_v44, %v895_v13  ;;  %v919_v22 = vpop.permute.xlu1 %918  ;;  %v917_v30 = vpop.permute.xlu0 %916  ;;  %v2685_v62 = vmul.f32 %v2429_v7, %v2666_v23 }
  0xd6   :  { %v902_v12 = vadd.f32 %v3112_v33, %v882_v47  ;;  %v2690_v2 = vmul.f32 %v2429_v7, %v2669_v14  ;;  %v2694_v32 = vmul.f32 %v2429_v7, %v2672_v9  ;;  %v2698_v39 = vmul.f32 %v2436_v15, %v2666_v23 }
  0xd7   :  { %v332_v29 = vadd.f32 %v330_v20, %v2530_v0  ;;  %v923_v52 = vmul.f32 %v919_v22, %v3106_v50  ;;  %v908_v31 = vadd.f32 %v3115_v53, %v888_v51  ;;  %v914_v1 = vadd.f32 %v3116_v19, %v894_v28  ;;  %v3117_v28 = vld [vmem:[#allocation66_spill] sm:$0xff]  ;;  %v3118_v20 = vld [vmem:[#allocation67_spill] sm:$0xff] }
  0xd8   :  { %3113 = vst [vmem:[#allocation36_spill] sm:$0xff] %v2694_v32  ;;  %3114 = vst [vmem:[#allocation40_spill] sm:$0xff] %v2698_v39  ;;  %v338_v57 = vadd.f32 %v336_v16, %v2536_v35  ;;  %v344_v5 = vadd.f32 %v342_v45, %v2544_v42  ;;  %v331_v60 = vadd.f32 %v329_v49, %v2553_v11  ;;  %v3139_v39 = vld [vmem:[#allocation84_spill] sm:$0xff] }
  0xd9   :  { %v929_v7 = vmul.f32 %v919_v22, %v3108_v46  ;;  %v337_v40 = vadd.f32 %v335_v4, %v2556_v17  ;;  %v343_v13 = vadd.f32 %v341_v61, %v2559_v10  ;;  %v935_v0 = vmul.f32 %v919_v22, %v3109_v6  ;;  %v348_v58 = vpop.permute.xlu1 %347  ;;  %v346_v47 = vpop.permute.xlu0 %345 }
  0xda   :  { %v922_v37 = vmul.f32 %v917_v30, %v3106_v50  ;;  %v928_v51 = vmul.f32 %v917_v30, %v3108_v46  ;;  %v352_v35 = vmul.f32 %v3117_v28, %v348_v58  ;;  %v358_v42 = vmul.f32 %v3118_v20, %v348_v58 }
  0xdb   :  { %v364_v11 = vmul.f32 %v3119_v24, %v348_v58  ;;  %v925_v16 = vadd.f32 %v923_v52, %v903_v25  ;;  %v351_v17 = vmul.f32 %v3117_v28, %v346_v47  ;;  %v357_v10 = vmul.f32 %v3118_v20, %v346_v47 }
  0xdc   :  { %v363_v45 = vmul.f32 %v3119_v24, %v346_v47  ;;  %v931_v50 = vadd.f32 %v929_v7, %v909_v55  ;;  %v934_v49 = vmul.f32 %v917_v30, %v3109_v6  ;;  %v354_v3 = vadd.f32 %v352_v35, %v332_v29  ;;  %v3120_v29 = vld [vmem:[#allocation69_spill] sm:$0xff] }
  0xdd   :  { %v360_v46 = vadd.f32 %v358_v42, %v338_v57  ;;  %v366_v4 = vadd.f32 %v364_v11, %v344_v5  ;;  %v353_v61 = vadd.f32 %v351_v17, %v331_v60  ;;  %v359_v44 = vadd.f32 %v357_v10, %v337_v40  ;;  %v941_v33 = vpop.permute.xlu1 %940  ;;  %v939_v53 = vpop.permute.xlu0 %938  ;;  %v3121_v5 = vld [vmem:[#allocation70_spill] sm:$0xff]  ;;  %v3122_v11 = vld [vmem:[#allocation72_spill] sm:$0xff]  ;;  %v3123_v10 = vld [vmem:[#allocation71_spill] sm:$0xff] }
  0xde   :  { %v365_v22 = vadd.f32 %v363_v45, %v343_v13  ;;  %v945_v25 = vmul.f32 %v941_v33, %v3117_v28  ;;  %v951_v52 = vmul.f32 %v941_v33, %v3118_v20  ;;  %v957_v19 = vmul.f32 %v941_v33, %v3119_v24 }
  0xdf   :  { %v944_v55 = vmul.f32 %v939_v53, %v3117_v28  ;;  %v950_v6 = vmul.f32 %v939_v53, %v3118_v20  ;;  %v956_v30 = vmul.f32 %v939_v53, %v3119_v24  ;;  %v374_v57 = vadd.f32 %v3120_v29, %v354_v3  ;;  %v3124_v24 = vld [vmem:[#allocation73_spill] sm:$0xff] }
  0xe0   :  { %v380_v60 = vadd.f32 %v3121_v5, %v360_v46  ;;  %v937_v7 = vadd.f32 %v935_v0, %v915_v54  ;;  %v924_v40 = vadd.f32 %v922_v37, %v902_v12  ;;  %v930_v13 = vadd.f32 %v928_v51, %v908_v31  ;;  %v3126_v12 = vld [vmem:[#allocation78_spill] sm:$0xff]  ;;  %v3128_v37 = vld [vmem:[#allocation81_spill] sm:$0xff] }
  0xe1   :  { %v947_v58 = vadd.f32 %v945_v25, %v925_v16  ;;  %v936_v47 = vadd.f32 %v934_v49, %v914_v1  ;;  %v953_v35 = vadd.f32 %v951_v52, %v931_v50  ;;  %v390_v42 = vpop.permute.xlu1 %389  ;;  %v386_v28 = vadd.f32 %v3122_v11, %v366_v4  ;;  %v388_v17 = vpop.permute.xlu0 %387  ;;  %v3127_v1 = vld [vmem:[#allocation74_spill] sm:$0xff]  ;;  %v3130_v4 = vld [vmem:[#allocation75_spill] sm:$0xff]  ;;  %v3131_v52 = vld [vmem:[#allocation76_spill] sm:$0xff] }
  0xe2   :  { %v373_v45 = vadd.f32 %v3123_v10, %v353_v61  ;;  %v959_v20 = vadd.f32 %v957_v19, %v937_v7  ;;  %v946_v33 = vadd.f32 %v944_v55, %v924_v40  ;;  %v379_v53 = vadd.f32 %v3124_v24, %v359_v44  ;;  %v3129_v16 = vld [vmem:[#allocation82_spill] sm:$0xff]  ;;  %v3133_v29 = vld [vmem:[#allocation77_spill] sm:$0xff]  ;;  %v3138_v11 = vld [vmem:[#allocation83_spill] sm:$0xff] }
  0xe3   :  { %v2738_v3 = vstv %s2716_s12  ;;  %v952_v46 = vadd.f32 %v950_v6, %v930_v13  ;;  %v958_v54 = vadd.f32 %v956_v30, %v936_v47  ;;  %v394_v31 = vmul.f32 %v3126_v12, %v390_v42 }
  0xe4   :  { %3125 = vst [vmem:[#allocation39_spill] sm:$0xff] %v2738_v3  ;;  %v385_v0 = vadd.f32 %v3127_v1, %v365_v22  ;;  %v400_v51 = vmul.f32 %v3128_v37, %v390_v42  ;;  %v406_v50 = vmul.f32 %v3129_v16, %v390_v42  ;;  %v393_v49 = vmul.f32 %v3126_v12, %v388_v17  ;;  %v3137_v42 = vld [vmem:[#allocation80_spill] sm:$0xff] }
  0xe5   :  { %v967_v61 = vadd.f32 %v3130_v4, %v947_v58  ;;  %v399_v25 = vmul.f32 %v3128_v37, %v388_v17  ;;  %v405_v44 = vmul.f32 %v3129_v16, %v388_v17  ;;  %v973_v19 = vadd.f32 %v3131_v52, %v953_v35  ;;  %v983_v55 = vpop.permute.xlu1 %982  ;;  %v981_v6 = vpop.permute.xlu0 %980  ;;  %v3136_v58 = vld [vmem:[#allocation79_spill] sm:$0xff] }
  0xe6   :  { %v2750_v30 = vstv %s2722_s13  ;;  %v979_v22 = vadd.f32 %v3133_v29, %v959_v20  ;;  %v987_v5 = vmul.f32 %v983_v55, %v3126_v12  ;;  %v2755_v7 = vstv %s2728_s21 }
  0xe7   :  { %3132 = vst [vmem:[#allocation43_spill] sm:$0xff] %v2750_v30  ;;  %3134 = vst [vmem:[#allocation44_spill] sm:$0xff] %v2755_v7  ;;  %v2759_v40 = vmul.f32 %v2436_v15, %v2669_v14  ;;  %v993_v13 = vmul.f32 %v983_v55, %v3128_v37  ;;  %v966_v47 = vadd.f32 %v3136_v58, %v946_v33  ;;  %v3140_v33 = vld [vmem:[#allocation85_spill] sm:$0xff] }
  0xe8   :  { %v972_v35 = vadd.f32 %v3137_v42, %v952_v46  ;;  %v978_v17 = vadd.f32 %v3138_v11, %v958_v54  ;;  %v396_v10 = vadd.f32 %v394_v31, %v374_v57  ;;  %v402_v24 = vadd.f32 %v400_v51, %v380_v60  ;;  %v3141_v46 = vld [vmem:[#allocation89_spill] sm:$0xff] }
  0xe9   :  { %3135 = vst [vmem:[#allocation37_spill] sm:$0xff] %v2759_v40  ;;  %v408_v1 = vadd.f32 %v406_v50, %v386_v28  ;;  %v395_v20 = vadd.f32 %v393_v49, %v373_v45  ;;  %v401_v4 = vadd.f32 %v399_v25, %v379_v53  ;;  %v407_v52 = vadd.f32 %v405_v44, %v385_v0  ;;  %v412_v30 = vpop.permute.xlu1 %411  ;;  %v410_v40 = vpop.permute.xlu0 %409 }
  0xea   :  { %v999_v29 = vmul.f32 %v983_v55, %v3129_v16  ;;  %v986_v7 = vmul.f32 %v981_v6, %v3126_v12  ;;  %v989_v3 = vadd.f32 %v987_v5, %v967_v61  ;;  %v416_v32 = vmul.f32 %v3139_v39, %v412_v30  ;;  %v3143_v5 = vld [vmem:[#allocation87_spill] sm:$0xff] }
  0xeb   :  { %v422_v58 = vmul.f32 %v3140_v33, %v412_v30  ;;  %v428_v42 = vmul.f32 %v3141_v46, %v412_v30  ;;  %v995_v54 = vadd.f32 %v993_v13, %v973_v19  ;;  %v415_v57 = vmul.f32 %v3139_v39, %v410_v40 }
  0xec   :  { %v421_v60 = vmul.f32 %v3140_v33, %v410_v40  ;;  %v427_v28 = vmul.f32 %v3141_v46, %v410_v40  ;;  %v992_v45 = vmul.f32 %v981_v6, %v3128_v37  ;;  %v998_v53 = vmul.f32 %v981_v6, %v3129_v16 }
  0xed   :  { %v418_v12 = vadd.f32 %v416_v32, %v396_v10  ;;  %v424_v31 = vadd.f32 %v422_v58, %v402_v24  ;;  %v430_v0 = vadd.f32 %v428_v42, %v408_v1  ;;  %v417_v51 = vadd.f32 %v415_v57, %v395_v20  ;;  %v1005_v61 = vpop.permute.xlu1 %1004  ;;  %v1003_v25 = vpop.permute.xlu0 %1002  ;;  %v3142_v32 = vld [vmem:[#allocation86_spill] sm:$0xff]  ;;  %v3145_v57 = vld [vmem:[#allocation88_spill] sm:$0xff] }
  0xee   :  { %v423_v50 = vadd.f32 %v421_v60, %v401_v4  ;;  %v429_v49 = vadd.f32 %v427_v28, %v407_v52  ;;  %v1009_v44 = vmul.f32 %v1005_v61, %v3139_v39  ;;  %v1015_v19 = vmul.f32 %v1005_v61, %v3140_v33  ;;  %v3144_v52 = vld [vmem:[#allocation90_spill] sm:$0xff]  ;;  %v3146_v28 = vld [vmem:[#allocation91_spill] sm:$0xff] }
  0xef   :  { %v1021_v55 = vmul.f32 %v1005_v61, %v3141_v46  ;;  %v1008_v30 = vmul.f32 %v1003_v25, %v3139_v39  ;;  %v1014_v37 = vmul.f32 %v1003_v25, %v3140_v33  ;;  %v1020_v16 = vmul.f32 %v1003_v25, %v3141_v46 }
  0xf0   :  { %v439_v6 = vadd.f32 %v3142_v32, %v418_v12  ;;  %v445_v40 = vadd.f32 %v3143_v5, %v424_v31  ;;  %v1001_v13 = vadd.f32 %v999_v29, %v979_v22  ;;  %v988_v11 = vadd.f32 %v986_v7, %v966_v47  ;;  %v3147_v47 = vld [vmem:[#allocation93_spill] sm:$0xff]  ;;  %v3149_v29 = vld [vmem:[#allocation100_spill] sm:$0xff] }
  0xf1   :  { %v994_v10 = vadd.f32 %v992_v45, %v972_v35  ;;  %v1011_v24 = vadd.f32 %v1009_v44, %v989_v3  ;;  %v1000_v1 = vadd.f32 %v998_v53, %v978_v17  ;;  %v1017_v20 = vadd.f32 %v1015_v19, %v995_v54  ;;  %v455_v4 = vpop.permute.xlu1 %454  ;;  %v453_v42 = vpop.permute.xlu0 %452  ;;  %v3148_v35 = vld [vmem:[#allocation94_spill] sm:$0xff]  ;;  %v3150_v45 = vld [vmem:[#allocation101_spill] sm:$0xff] }
  0xf2   :  { %v451_v58 = vadd.f32 %v3144_v52, %v430_v0  ;;  %v438_v39 = vadd.f32 %v3145_v57, %v417_v51  ;;  %v1023_v60 = vadd.f32 %v1021_v55, %v1001_v13  ;;  %v1010_v33 = vadd.f32 %v1008_v30, %v988_v11  ;;  %v3151_v0 = vld [vmem:[#allocation92_spill] sm:$0xff]  ;;  %v3156_v13 = vld [vmem:[#allocation97_spill] sm:$0xff] }
  0xf3   :  { %v444_v46 = vadd.f32 %v3146_v28, %v423_v50  ;;  %v2788_v12 = vmul.f32 %v2436_v15, %v2672_v9  ;;  %v1016_v22 = vadd.f32 %v1014_v37, %v994_v10  ;;  %v1022_v7 = vadd.f32 %v1020_v16, %v1000_v1  ;;  %v3152_v15 = vld [vmem:[#allocation95_spill] sm:$0xff]  ;;  %v3157_v10 = vld [vmem:[#allocation98_spill] sm:$0xff] }
  0xf4   :  { %v459_v3 = vmul.f32 %v3147_v47, %v455_v4  ;;  %v450_v17 = vadd.f32 %v3148_v35, %v429_v49  ;;  %v465_v54 = vmul.f32 %v3149_v29, %v455_v4  ;;  %v471_v53 = vmul.f32 %v3150_v45, %v455_v4  ;;  %v3153_v49 = vld [vmem:[#allocation96_spill] sm:$0xff]  ;;  %v3158_v1 = vld [vmem:[#allocation99_spill] sm:$0xff] }
  0xf5   :  { %v458_v31 = vmul.f32 %v3147_v47, %v453_v42  ;;  %v1032_v51 = vadd.f32 %v3151_v0, %v1011_v24  ;;  %v464_v50 = vmul.f32 %v3149_v29, %v453_v42  ;;  %v470_v61 = vmul.f32 %v3150_v45, %v453_v42  ;;  %v1048_v44 = vpop.permute.xlu1 %1047  ;;  %v1046_v19 = vpop.permute.xlu0 %1045 }
  0xf6   :  { %v1038_v25 = vadd.f32 %v3152_v15, %v1017_v20  ;;  %v2801_v55 = vmul.f32 %v2452_v59, %v2666_v23  ;;  %v1044_v30 = vadd.f32 %v3153_v49, %v1023_v60  ;;  %v1052_v37 = vmul.f32 %v1048_v44, %v3147_v47 }
  0xf7   :  { %v2807_v16 = vmul.f32 %v2452_v59, %v2669_v14  ;;  %v2811_v32 = vmul.f32 %v2452_v59, %v2672_v9  ;;  %v1058_v5 = vmul.f32 %v1048_v44, %v3149_v29  ;;  %v1031_v11 = vadd.f32 %v3156_v13, %v1010_v33  ;;  %v3160_v33 = vld [vmem:[#allocation103_spill] sm:$0xff] }
  0xf8   :  { %v1037_v24 = vadd.f32 %v3157_v10, %v1016_v22  ;;  %v1043_v20 = vadd.f32 %v3158_v1, %v1022_v7  ;;  %v461_v4 = vadd.f32 %v459_v3, %v439_v6  ;;  %v467_v52 = vadd.f32 %v465_v54, %v445_v40  ;;  %v3161_v22 = vld [vmem:[#allocation104_spill] sm:$0xff] }
  0xf9   :  { %3154 = vst [vmem:[#allocation41_spill] sm:$0xff] %v2807_v16  ;;  %3155 = vst [vmem:[#allocation20_spill] sm:$0xff] %v2811_v32  ;;  %v473_v42 = vadd.f32 %v471_v53, %v451_v58  ;;  %v460_v57 = vadd.f32 %v458_v31, %v438_v39  ;;  %v466_v60 = vadd.f32 %v464_v50, %v444_v46  ;;  %v477_v59 = vpop.permute.xlu1 %476  ;;  %v475_v15 = vpop.permute.xlu0 %474  ;;  %v3159_v32 = vld [vmem:[#allocation102_spill] sm:$0xff] }
  0xfa   :  { %v472_v28 = vadd.f32 %v470_v61, %v450_v17  ;;  %v1064_v35 = vmul.f32 %v1048_v44, %v3150_v45  ;;  %v1051_v0 = vmul.f32 %v1046_v19, %v3147_v47  ;;  %v1054_v49 = vadd.f32 %v1052_v37, %v1032_v51 }
  0xfb   :  { %v481_v16 = vmul.f32 %v3159_v32, %v477_v59  ;;  %v487_v13 = vmul.f32 %v3160_v33, %v477_v59  ;;  %v493_v10 = vmul.f32 %v3161_v22, %v477_v59  ;;  %v1060_v7 = vadd.f32 %v1058_v5, %v1038_v25  ;;  %v3163_v5 = vld [vmem:[#allocation106_spill] sm:$0xff] }
  0xfc   :  { %v480_v6 = vmul.f32 %v3159_v32, %v475_v15  ;;  %v486_v40 = vmul.f32 %v3160_v33, %v475_v15  ;;  %v492_v58 = vmul.f32 %v3161_v22, %v475_v15  ;;  %v1057_v39 = vmul.f32 %v1046_v19, %v3149_v29 }
  0xfd   :  { %v1063_v46 = vmul.f32 %v1046_v19, %v3150_v45  ;;  %v483_v47 = vadd.f32 %v481_v16, %v461_v4  ;;  %v489_v3 = vadd.f32 %v487_v13, %v467_v52  ;;  %v495_v17 = vadd.f32 %v493_v10, %v473_v42  ;;  %v1070_v51 = vpop.permute.xlu1 %1069  ;;  %v1068_v50 = vpop.permute.xlu0 %1067  ;;  %v3162_v19 = vld [vmem:[#allocation105_spill] sm:$0xff]  ;;  %v3164_v13 = vld [vmem:[#allocation107_spill] sm:$0xff] }
  0xfe   :  { %v482_v54 = vadd.f32 %v480_v6, %v460_v57  ;;  %v488_v53 = vadd.f32 %v486_v40, %v466_v60  ;;  %v494_v31 = vadd.f32 %v492_v58, %v472_v28  ;;  %v1074_v61 = vmul.f32 %v1070_v51, %v3159_v32 }
  0xff   :  { %v1080_v25 = vmul.f32 %v1070_v51, %v3160_v33  ;;  %v1086_v44 = vmul.f32 %v1070_v51, %v3161_v22  ;;  %v1073_v37 = vmul.f32 %v1068_v50, %v3159_v32  ;;  %v1079_v29 = vmul.f32 %v1068_v50, %v3160_v33 }
 0x100   :  { %v1085_v45 = vmul.f32 %v1068_v50, %v3161_v22  ;;  %v503_v16 = vadd.f32 %v3162_v19, %v483_v47  ;;  %v509_v1 = vadd.f32 %v3163_v5, %v489_v3  ;;  %v1066_v4 = vadd.f32 %v1064_v35, %v1044_v30 }
 0x101   :  { %v1053_v52 = vadd.f32 %v1051_v0, %v1031_v11  ;;  %v1059_v42 = vadd.f32 %v1057_v39, %v1037_v24  ;;  %v1076_v57 = vadd.f32 %v1074_v61, %v1054_v49  ;;  %v1065_v60 = vadd.f32 %v1063_v46, %v1043_v20  ;;  %v519_v59 = vpop.permute.xlu1 %518  ;;  %v517_v32 = vpop.permute.xlu0 %516  ;;  %v3165_v20 = vld [vmem:[#allocation109_spill] sm:$0xff]  ;;  %v3167_v39 = vld [vmem:[#allocation35_spill] sm:$0xff] }
 0x102   :  { %v1082_v28 = vadd.f32 %v1080_v25, %v1060_v7  ;;  %v515_v15 = vadd.f32 %v2465_v43, %v495_v17  ;;  %v502_v10 = vadd.f32 %v3164_v13, %v482_v54  ;;  %v1088_v6 = vadd.f32 %v1086_v44, %v1066_v4  ;;  %v3166_v7 = vld [vmem:[#allocation108_spill] sm:$0xff] }
 0x103   :  { %v1075_v33 = vadd.f32 %v1073_v37, %v1053_v52  ;;  %v508_v22 = vadd.f32 %v2415_v34, %v488_v53  ;;  %v2842_v40 = vmul.f32 %v2461_v48, %v2666_v23  ;;  %v1081_v30 = vadd.f32 %v1079_v29, %v1059_v42 }
 0x104   :  { %v1087_v11 = vadd.f32 %v1085_v45, %v1065_v60  ;;  %v523_v24 = vmul.f32 %v2577_v56, %v519_v59  ;;  %v514_v35 = vadd.f32 %v3165_v20, %v494_v31  ;;  %v529_v43 = vmul.f32 %v2625_v21, %v519_v59 }
 0x105   :  { %v535_v0 = vmul.f32 %v2646_v18, %v519_v59  ;;  %v522_v49 = vmul.f32 %v2577_v56, %v517_v32  ;;  %v1096_v58 = vadd.f32 %v3166_v7, %v1076_v57  ;;  %v528_v34 = vmul.f32 %v2625_v21, %v517_v32  ;;  %v1112_v47 = vpop.permute.xlu1 %1111  ;;  %v1110_v3 = vpop.permute.xlu0 %1109  ;;  %v3168_v7 = vld [vmem:[#allocation36_spill] sm:$0xff] }
 0x106   :  { %v534_v23 = vmul.f32 %v2646_v18, %v517_v32  ;;  %v1102_v46 = vadd.f32 %v3167_v39, %v1082_v28  ;;  %v2855_v17 = vmul.f32 %v2461_v48, %v2669_v14  ;;  %v1108_v54 = vadd.f32 %v2563_v36, %v1088_v6 }
 0x107   :  { %v1116_v53 = vmul.f32 %v1112_v47, %v2577_v56  ;;  %v2861_v31 = vmul.f32 %v2461_v48, %v2672_v9  ;;  %v2864_v51 = vstv %s2831_s4  ;;  %v1122_v50 = vmul.f32 %v1112_v47, %v2625_v21 }
 0x108   :  { %v1095_v61 = vadd.f32 %v2582_v41, %v1075_v33  ;;  %v1101_v25 = vadd.f32 %v2594_v38, %v1081_v30  ;;  %v1107_v44 = vadd.f32 %v2629_v26, %v1087_v11  ;;  %v525_v14 = vadd.f32 %v523_v24, %v503_v16 }
 0x109   :  { %v531_v37 = vadd.f32 %v529_v43, %v509_v1  ;;  %v537_v29 = vadd.f32 %v535_v0, %v515_v15  ;;  %v524_v36 = vadd.f32 %v522_v49, %v502_v10  ;;  %v530_v45 = vadd.f32 %v528_v34, %v508_v22  ;;  %v541_v9 = vpop.permute.xlu1 %540 }
 0x10a   :  { %v536_v19 = vadd.f32 %v534_v23, %v514_v35  ;;  %v1128_v5 = vmul.f32 %v1112_v47, %v2646_v18  ;;  %v1115_v48 = vmul.f32 %v1110_v3, %v2577_v56  ;;  %v1118_v4 = vadd.f32 %v1116_v53, %v1096_v58  ;;  %v539_v42 = vpop.permute.xlu0 %538  ;;  %v3169_v47 = vld [vmem:[#allocation40_spill] sm:$0xff]  ;;  %v3170_v53 = vld [vmem:[#allocation39_spill] sm:$0xff] }
 0x10b   :  { %v545_v52 = vmul.f32 %v2651_v63, %v541_v9  ;;  %v551_v41 = vmul.f32 %v2654_v27, %v541_v9  ;;  %v557_v38 = vmul.f32 %v2663_v8, %v541_v9  ;;  %v1124_v26 = vadd.f32 %v1122_v50, %v1102_v46  ;;  %v3171_v50 = vld [vmem:[#allocation37_spill] sm:$0xff] }
 0x10c   :  { %v544_v16 = vmul.f32 %v2651_v63, %v539_v42  ;;  %v550_v1 = vmul.f32 %v2654_v27, %v539_v42  ;;  %v556_v57 = vmul.f32 %v2663_v8, %v539_v42  ;;  %v1121_v60 = vmul.f32 %v1110_v3, %v2625_v21  ;;  %v3175_v42 = vld [vmem:[#allocation20_spill] sm:$0xff] }
 0x10d   :  { %v547_v28 = vadd.f32 %v545_v52, %v525_v14  ;;  %v553_v56 = vadd.f32 %v551_v41, %v531_v37  ;;  %v559_v59 = vadd.f32 %v557_v38, %v537_v29  ;;  %v1127_v15 = vmul.f32 %v1110_v3, %v2646_v18  ;;  %v1134_v6 = vpop.permute.xlu1 %1133  ;;  %v3172_v14 = vld [vmem:[#allocation43_spill] sm:$0xff] }
 0x10e   :  { %v546_v32 = vadd.f32 %v544_v16, %v524_v36  ;;  %v552_v13 = vadd.f32 %v550_v1, %v530_v45  ;;  %v558_v10 = vadd.f32 %v556_v57, %v536_v19  ;;  %v1138_v33 = vmul.f32 %v1134_v6, %v2651_v63  ;;  %v1132_v21 = vpop.permute.xlu0 %1131 }
 0x10f   :  { %v1144_v22 = vmul.f32 %v1134_v6, %v2654_v27  ;;  %v1150_v30 = vmul.f32 %v1134_v6, %v2663_v8  ;;  %v567_v11 = vadd.f32 %v2685_v62, %v547_v28  ;;  %v1137_v24 = vmul.f32 %v1132_v21, %v2651_v63 }
 0x110   :  { %v1143_v20 = vmul.f32 %v1132_v21, %v2654_v27  ;;  %v1149_v18 = vmul.f32 %v1132_v21, %v2663_v8  ;;  %v573_v35 = vadd.f32 %v2690_v2, %v553_v56  ;;  %v1130_v43 = vadd.f32 %v1128_v5, %v1108_v54 }
 0x111   :  { %v1117_v0 = vadd.f32 %v1115_v48, %v1095_v61  ;;  %v1140_v49 = vadd.f32 %v1138_v33, %v1118_v4  ;;  %v579_v58 = vadd.f32 %v3168_v7, %v559_v59  ;;  %v1123_v34 = vadd.f32 %v1121_v60, %v1101_v25  ;;  %v583_v46 = vpop.permute.xlu1 %582  ;;  %v3174_v48 = vld [vmem:[#allocation41_spill] sm:$0xff] }
 0x112   :  { %v1129_v23 = vadd.f32 %v1127_v15, %v1107_v44  ;;  %v1146_v39 = vadd.f32 %v1144_v22, %v1124_v26  ;;  %v566_v3 = vadd.f32 %v3169_v47, %v546_v32  ;;  %v1152_v62 = vadd.f32 %v1150_v30, %v1130_v43  ;;  %v581_v8 = vpop.permute.xlu0 %580  ;;  %v3173_v44 = vld [vmem:[#allocation44_spill] sm:$0xff] }
 0x113   :  { %v1139_v63 = vadd.f32 %v1137_v24, %v1117_v0  ;;  %v587_v27 = vmul.f32 %v3170_v53, %v583_v46  ;;  %v572_v2 = vadd.f32 %v3171_v50, %v552_v13  ;;  %v1145_v54 = vadd.f32 %v1143_v20, %v1123_v34 }
 0x114   :  { %v1151_v61 = vadd.f32 %v1149_v18, %v1129_v23  ;;  %v593_v37 = vmul.f32 %v3172_v14, %v583_v46  ;;  %v578_v25 = vadd.f32 %v2788_v12, %v558_v10  ;;  %v599_v29 = vmul.f32 %v3173_v44, %v583_v46 }
 0x115   :  { %v586_v36 = vmul.f32 %v3170_v53, %v581_v8  ;;  %v592_v45 = vmul.f32 %v3172_v14, %v581_v8  ;;  %v1160_v19 = vadd.f32 %v2801_v55, %v1140_v49  ;;  %v598_v5 = vmul.f32 %v3173_v44, %v581_v8  ;;  %v1176_v4 = vpop.permute.xlu1 %1175 }
 0x116   :  { %v1166_v9 = vadd.f32 %v3174_v48, %v1146_v39  ;;  %v613_v52 = vstv %s2879_s15  ;;  %v619_v41 = vstv %s2882_s16  ;;  %v589_v38 = vadd.f32 %v587_v27, %v567_v11  ;;  %v1174_v1 = vpop.permute.xlu0 %1173 }
 0x117   :  { %v1172_v26 = vadd.f32 %v3175_v42, %v1152_v62  ;;  %v1180_v12 = vmul.f32 %v1176_v4, %v3170_v53  ;;  %v1186_v16 = vmul.f32 %v1176_v4, %v3172_v14  ;;  %v595_v57 = vadd.f32 %v593_v37, %v573_v35 }
 0x118   :  { %v1159_v60 = vadd.f32 %v2842_v40, %v1139_v63  ;;  %v1165_v55 = vadd.f32 %v2855_v17, %v1145_v54  ;;  %v1171_v28 = vadd.f32 %v2861_v31, %v1151_v61  ;;  %v601_v56 = vadd.f32 %v599_v29, %v579_v58 }
 0x119   :  { %v588_v59 = vadd.f32 %v586_v36, %v566_v3  ;;  %v594_v15 = vadd.f32 %v592_v45, %v572_v2  ;;  %v1192_v32 = vmul.f32 %v1176_v4, %v3173_v44  ;;  %v600_v13 = vadd.f32 %v598_v5, %v578_v25  ;;  %v605_v22 = vpop.permute.xlu1 %604 }
 0x11a   :  { %v1182_v10 = vadd.f32 %v1180_v12, %v1160_v19  ;;  %v1188_v6 = vadd.f32 %v1186_v16, %v1166_v9  ;;  %v1179_v33 = vmul.f32 %v1174_v1, %v3170_v53  ;;  %v1185_v30 = vmul.f32 %v1174_v1, %v3172_v14  ;;  %v603_v17 = vpop.permute.xlu0 %602 }
 0x11b   :  { %v609_v21 = vmul.f32 %v2864_v51, %v605_v22  ;;  %v615_v40 = vmul.f32 %v613_v52, %v605_v22  ;;  %v621_v11 = vmul.f32 %v619_v41, %v605_v22  ;;  %v1191_v31 = vmul.f32 %v1174_v1, %v3173_v44 }
 0x11c   :  { %v608_v24 = vmul.f32 %v2864_v51, %v603_v17  ;;  %v614_v20 = vmul.f32 %v613_v52, %v603_v17  ;;  %v620_v18 = vmul.f32 %v619_v41, %v603_v17  ;;  %v1194_v35 = vadd.f32 %v1192_v32, %v1172_v26 }
 0x11d   :  { %v611_v43 = vadd.f32 %v609_v21, %v589_v38  ;;  %v617_v0 = vadd.f32 %v615_v40, %v595_v57  ;;  %v623_v49 = vadd.f32 %v621_v11, %v601_v56  ;;  %v1181_v7 = vadd.f32 %v1179_v33, %v1159_v60 }
 0x11e   :  { %v610_v58 = vadd.f32 %v608_v24, %v588_v59  ;;  %v616_v34 = vadd.f32 %v614_v20, %v594_v15  ;;  %v622_v23 = vadd.f32 %v620_v18, %v600_v13  ;;  %v1198_v39 = vpop.permute.xlu1 %1197  ;;  %v1187_v46 = vadd.f32 %v1185_v30, %v1165_v55 }
 0x11f   :  { %625 = vst [vmem:[#allocation7 + $0x8] sm:$0xff] %v611_v43  ;;  %628 = vst [vmem:[#allocation7 + $0x18] sm:$0xff] %v617_v0  ;;  %v1202_v47 = vmul.f32 %v1198_v39, %v2864_v51  ;;  %v1208_v3 = vmul.f32 %v1198_v39, %v613_v52  ;;  %v1214_v62 = vmul.f32 %v1198_v39, %v619_v41  ;;  %v1196_v63 = vpop.permute.xlu0 %1195 }
 0x120   :  { %631 = vst [vmem:[#allocation7 + $0x28] sm:$0xff] %v623_v49  ;;  %v1193_v53 = vadd.f32 %v1191_v31, %v1171_v28  ;;  %624 = vst [vmem:[#allocation7] sm:$0xff] %v610_v58  ;;  %v1201_v27 = vmul.f32 %v1196_v63, %v2864_v51  ;;  %v1207_v8 = vmul.f32 %v1196_v63, %v613_v52 }
 0x121   :  { %627 = vst [vmem:[#allocation7 + $0x10] sm:$0xff] %v616_v34  ;;  %630 = vst [vmem:[#allocation7 + $0x20] sm:$0xff] %v622_v23  ;;  %v1213_v50 = vmul.f32 %v1196_v63, %v619_v41  ;;  %v1204_v2 = vadd.f32 %v1202_v47, %v1182_v10  ;;  %v1210_v54 = vadd.f32 %v1208_v3, %v1188_v6 }
 0x122   :  { %v1216_v61 = vadd.f32 %v1214_v62, %v1194_v35  ;;  %v1203_v14 = vadd.f32 %v1201_v27, %v1181_v7  ;;  %v1209_v37 = vadd.f32 %v1207_v8, %v1187_v46 }
 0x123   :  { %v1215_v25 = vadd.f32 %v1213_v50, %v1193_v53  ;;  %1219 = vst [vmem:[#allocation7 + $0x38] sm:$0xff] %v1204_v2  ;;  %1222 = vst [vmem:[#allocation7 + $0x48] sm:$0xff] %v1210_v54 }
 0x124   :  { %1225 = vst [vmem:[#allocation7 + $0x58] sm:$0xff] %v1216_v61  ;;  %1218 = vst [vmem:[#allocation7 + $0x30] sm:$0xff] %v1203_v14 }
 0x125   :  { %1221 = vst [vmem:[#allocation7 + $0x40] sm:$0xff] %v1209_v37  ;;  %1224 = vst [vmem:[#allocation7 + $0x50] sm:$0xff] %v1215_v25 }
 0x126   :  { %1480 = shalt.err (!%p1477_p0)
}
 0x127   :  { %s1500_s9 = smov 128   ;;  %s1501_s3 = smov 8  }
 0x128   :  { %s3176_s23 = sld [smem:[#allocation110_spill]] }
 0x12e   :  { %1237 = dma.vmem_to_hbm [thread:$0]  %s1232_s22, 1536, %s3176_s23, [#allocation3], %s1500_s9, %s1500_s9, %s1501_s3  }
 0x12f   :  { %1493 = dma.done.wait [#allocation3], 1536  }
 0x130   :  { %1494 = vsyncadd [#allocation3], 4294965760 }
 0x131   :  { %1241 = vsyncpa [#allocation3], 1 }
 0x132   :  { %1242 = vsyncpa [#allocation4], 1 }
 0x133   :  { %1243 = vsyncpa [#allocation6], 1 }

</bundles_post_ra>
